<compile_context>
chip_gen: v6e
topology: v6e:2x2x1
jax: 0.10.0
libtpu: 0.0.40
codegen_flags: <defaults>
</compile_context>

<pallas_src>
import jax
import jax.numpy as jnp
from jax.experimental import pallas as pl
from jax.experimental.pallas import tpu as pltpu


# ----------------------------------------------------------------------------
# Fully fused forward kernel
# ----------------------------------------------------------------------------
def _lenet_kernel(x_ref, t1_ref, b1_ref, sh1_ref, sw1_ref,
                  t2_ref, b2_ref, sh2_ref, sw2_ref,
                  wf1_ref, bf1_ref, wf2_ref, bf2_ref, wf3_ref, bf3_ref,
                  o_ref):
    f32, bf16 = jnp.float32, jnp.bfloat16

    def rmat(a, w, exact=False):
        # (B, M, K) @ (K, N) -> (B, M, N); bf16 MXU inputs, f32 accumulation.
        if not exact:
            a, w = a.astype(bf16), w.astype(bf16)
        wb = jnp.broadcast_to(w, (a.shape[0],) + w.shape)
        return jnp.einsum('bmk,bkn->bmn', a, wb, preferred_element_type=f32)

    def lsel(sel, a):
        # exact 0/1 row-selection from the left: (S, M) @ (B, M, K) -> (B, S, K)
        sb = jnp.broadcast_to(sel, (a.shape[0],) + sel.shape)
        return jnp.einsum('bsm,bmk->bsk', sb, a, preferred_element_type=f32)

    def conv_pool(x, t_ref, b_row, sh_ref, sw_ref):
        # x: (nb, H, W*Cin) f32; t_ref: (KH, W*Cin, OW*Cout) banded conv matrices.
        kh = t_ref.shape[0]
        oh = x.shape[1] - kh + 1
        m = t_ref.shape[2]
        acc = jnp.zeros((x.shape[0], oh, m), f32)
        for i in range(kh):                                  # conv = KH banded matmuls
            acc = acc + rmat(x[:, i:i + oh, :], t_ref[i])
        acc = jnp.maximum(acc + b_row.reshape(1, 1, m), 0.0)  # bias + ReLU (f32)
        # 2x2 max-pool fused here: rows via left selection, cols via right selection.
        hp = jnp.maximum(lsel(sh_ref[0], acc), lsel(sh_ref[1], acc))
        return jnp.maximum(rmat(hp, sw_ref[0], exact=True),
                           rmat(hp, sw_ref[1], exact=True))

    x = x_ref[...]                                            # (nb, 32, 96) f32
    p1 = conv_pool(x, t1_ref, b1_ref[...], sh1_ref, sw1_ref)  # (nb, 14, 14*6)
    p2 = conv_pool(p1, t2_ref, b2_ref[...], sh2_ref, sw2_ref)  # (nb, 5, 5*16)

    # fc1: contraction over (row, W*C) done as 5 row-taps -> no in-kernel flatten.
    acc = jnp.zeros((p2.shape[0], 1, 120), f32)
    for y in range(5):
        acc = acc + rmat(p2[:, y:y + 1, :], wf1_ref[y])
    f1 = jnp.maximum(acc + bf1_ref[...].reshape(1, 1, 120), 0.0)
    f2 = jnp.maximum(rmat(f1, wf2_ref[...]) + bf2_ref[...].reshape(1, 1, 84), 0.0)
    f3 = rmat(f2, wf3_ref[...]) + bf3_ref[...].reshape(1, 1, 10)
    o_ref[...] = f3.astype(o_ref.dtype)


# ----------------------------------------------------------------------------
# One-time weight re-layout (init-time, outside the hot path)
# ----------------------------------------------------------------------------
def _conv_toeplitz(w_oihw, in_w):
    """(OC, IC, KH, KW) torch conv weight -> (KH, in_w*IC, out_w*OC) banded matrices."""
    oc, ic, kh, kw = w_oihw.shape
    out_w = in_w - kw + 1
    j = jnp.arange(kw)[:, None, None]
    wi = jnp.arange(in_w)[None, :, None]
    xi = jnp.arange(out_w)[None, None, :]
    band = (wi == xi + j).astype(jnp.float32)                 # (KW, in_w, out_w)
    t = jnp.einsum('jwx,ocij->iwcxo', band, w_oihw.astype(jnp.float32))
    return t.reshape(kh, in_w * ic, out_w * oc)


def _pool_rows(h):
    """(2, h//2, h) 0/1 matrices selecting even / odd rows."""
    s = jnp.arange(h // 2)[:, None]
    r = jnp.arange(h)[None, :]
    return jnp.stack([(r == 2 * s).astype(jnp.float32),
                      (r == 2 * s + 1).astype(jnp.float32)])


def _pool_cols(w, c):
    """(2, w*c, (w//2)*c) 0/1 matrices pooling the (col, channel) lane axis."""
    xi = jnp.arange(w)[:, None, None, None]
    ci = jnp.arange(c)[None, :, None, None]
    xo = jnp.arange(w // 2)[None, None, :, None]
    co = jnp.arange(c)[None, None, None, :]
    e = ((ci == co) & (xi == 2 * xo)).astype(jnp.float32).reshape(w * c, (w // 2) * c)
    o = ((ci == co) & (xi == 2 * xo + 1)).astype(jnp.float32).reshape(w * c, (w // 2) * c)
    return jnp.stack([e, o])


def prepare_params(p):
    """Re-layout torch-shaped params once; returns kernel-ready arrays."""
    wf1 = jnp.transpose(p["fc1_w"].reshape(120, 16, 5, 5), (2, 3, 1, 0))
    return dict(
        t1=_conv_toeplitz(p["conv1_w"], 32),                       # (5, 96, 168)
        b1=jnp.tile(p["conv1_b"], 28).reshape(1, 168),
        sh1=_pool_rows(28), sw1=_pool_cols(28, 6),
        t2=_conv_toeplitz(p["conv2_w"], 14),                       # (5, 84, 160)
        b2=jnp.tile(p["conv2_b"], 10).reshape(1, 160),
        sh2=_pool_rows(10), sw2=_pool_cols(10, 16),
        wf1=wf1.reshape(5, 5 * 16, 120),                           # (5, 80, 120)
        bf1=p["fc1_b"].reshape(1, 120),
        wf2=p["fc2_w"].T, bf2=p["fc2_b"].reshape(1, 84),           # (120, 84)
        wf3=p["fc3_w"].T, bf3=p["fc3_b"].reshape(1, 10),           # (84, 10)
    )


# ----------------------------------------------------------------------------
# Deterministic parameter init (same shapes / fan-in scaling as nn.Conv2d / Linear)
# ----------------------------------------------------------------------------
def init_params(key):
    ks = jax.random.split(key, 10)

    def u(k, shape, fan_in):
        bound = 1.0 / jnp.sqrt(jnp.float32(fan_in))
        return jax.random.uniform(k, shape, jnp.float32, -bound, bound)

    return {
        "conv1_w": u(ks[0], (6, 3, 5, 5), 3 * 5 * 5),
        "conv1_b": u(ks[1], (6,), 3 * 5 * 5),
        "conv2_w": u(ks[2], (16, 6, 5, 5), 6 * 5 * 5),
        "conv2_b": u(ks[3], (16,), 6 * 5 * 5),
        "fc1_w": u(ks[4], (120, 16 * 5 * 5), 16 * 5 * 5),
        "fc1_b": u(ks[5], (120,), 16 * 5 * 5),
        "fc2_w": u(ks[6], (84, 120), 120),
        "fc2_b": u(ks[7], (84,), 120),
        "fc3_w": u(ks[8], (10, 84), 84),
        "fc3_b": u(ks[9], (10,), 84),
    }


# ----------------------------------------------------------------------------
# Forward pass: one fused pallas_call
# ----------------------------------------------------------------------------
_ORDER = ("t1", "b1", "sh1", "sw1", "t2", "b2", "sh2", "sw2",
          "wf1", "bf1", "wf2", "bf2", "wf3", "bf3")


def net_forward(x_nchw, kp):
    n = x_nchw.shape[0]
    # NCHW -> (N, H, W*C) lane-dense layout; tiny one-off layout op in XLA.
    x = jnp.transpose(x_nchw, (0, 2, 3, 1)).reshape(n, 32, 32 * 3)

    def _full(arr):
        nd = arr.ndim
        return pl.BlockSpec(arr.shape, lambda i, nd=nd: (0,) * nd)

    in_specs = [pl.BlockSpec((1, 32, 96), lambda i: (i, 0, 0))]
    in_specs += [_full(kp[name]) for name in _ORDER]

    out = pl.pallas_call(
        _lenet_kernel,
        out_shape=jax.ShapeDtypeStruct((n, 1, 10), jnp.float32),
        grid=(n,),
        in_specs=in_specs,
        out_specs=pl.BlockSpec((1, 1, 10), lambda i: (i, 0, 0)),
        compiler_params=pltpu.CompilerParams(
            dimension_semantics=("parallel",)),
    )(x, *[kp[name] for name in _ORDER])
    return out.reshape(n, 10)


if __name__ == "__main__":
    key = jax.random.PRNGKey(0)
    kx, kparam = jax.random.split(key)
    # batch=2, NCHW like the PyTorch module; 32x32 is required by the 16*5*5 flatten.
    x = jax.random.uniform(kx, (2, 3, 32, 32), jnp.float32)
    params = init_params(kparam)
    kernel_params = prepare_params(params)     # one-time weight re-layout

    fwd = jax.jit(net_forward)
    out = jax.block_until_ready(fwd(x, kernel_params))
    assert out.shape == (2, 10) and out.dtype == jnp.float32
    print("KERNEL_OK")
</pallas_src>

<mosaic_0001>
module attributes {stable_mosaic.version = 11 : i64} {
  func.func @_lenet_kernel(%arg0: i32, %arg1: memref<1x32x96xf32, #tpu.memory_space<vmem>>, %arg2: memref<5x96x168xf32, #tpu.memory_space<vmem>>, %arg3: memref<1x168xf32, #tpu.memory_space<vmem>>, %arg4: memref<2x14x28xf32, #tpu.memory_space<vmem>>, %arg5: memref<2x168x84xf32, #tpu.memory_space<vmem>>, %arg6: memref<5x84x160xf32, #tpu.memory_space<vmem>>, %arg7: memref<1x160xf32, #tpu.memory_space<vmem>>, %arg8: memref<2x5x10xf32, #tpu.memory_space<vmem>>, %arg9: memref<2x160x80xf32, #tpu.memory_space<vmem>>, %arg10: memref<5x80x120xf32, #tpu.memory_space<vmem>>, %arg11: memref<1x120xf32, #tpu.memory_space<vmem>>, %arg12: memref<120x84xf32, #tpu.memory_space<vmem>>, %arg13: memref<1x84xf32, #tpu.memory_space<vmem>>, %arg14: memref<84x10xf32, #tpu.memory_space<vmem>>, %arg15: memref<1x10xf32, #tpu.memory_space<vmem>>, %arg16: memref<1x1x10xf32, #tpu.memory_space<vmem>>) attributes {dimension_semantics = [#tpu.dimension_semantics<parallel>], iteration_bounds = array<i64: 2>, scalar_prefetch = 0 : i64, scratch_operands = 0 : i64, tpu.core_type = #tpu.core_type<tc>, window_params = [{transform_indices = @transform_0, window_bounds = array<i64: 1, 32, 96>}, {pipeline_mode = #tpu.pipeline_mode<synchronous>, transform_indices = @transform_1, window_bounds = array<i64: 5, 96, 168>}, {pipeline_mode = #tpu.pipeline_mode<synchronous>, transform_indices = @transform_2, window_bounds = array<i64: 1, 168>}, {pipeline_mode = #tpu.pipeline_mode<synchronous>, transform_indices = @transform_3, window_bounds = array<i64: 2, 14, 28>}, {pipeline_mode = #tpu.pipeline_mode<synchronous>, transform_indices = @transform_4, window_bounds = array<i64: 2, 168, 84>}, {pipeline_mode = #tpu.pipeline_mode<synchronous>, transform_indices = @transform_5, window_bounds = array<i64: 5, 84, 160>}, {pipeline_mode = #tpu.pipeline_mode<synchronous>, transform_indices = @transform_6, window_bounds = array<i64: 1, 160>}, {pipeline_mode = #tpu.pipeline_mode<synchronous>, transform_indices = @transform_7, window_bounds = array<i64: 2, 5, 10>}, {pipeline_mode = #tpu.pipeline_mode<synchronous>, transform_indices = @transform_8, window_bounds = array<i64: 2, 160, 80>}, {pipeline_mode = #tpu.pipeline_mode<synchronous>, transform_indices = @transform_9, window_bounds = array<i64: 5, 80, 120>}, {pipeline_mode = #tpu.pipeline_mode<synchronous>, transform_indices = @transform_10, window_bounds = array<i64: 1, 120>}, {pipeline_mode = #tpu.pipeline_mode<synchronous>, transform_indices = @transform_11, window_bounds = array<i64: 120, 84>}, {pipeline_mode = #tpu.pipeline_mode<synchronous>, transform_indices = @transform_12, window_bounds = array<i64: 1, 84>}, {pipeline_mode = #tpu.pipeline_mode<synchronous>, transform_indices = @transform_13, window_bounds = array<i64: 84, 10>}, {pipeline_mode = #tpu.pipeline_mode<synchronous>, transform_indices = @transform_14, window_bounds = array<i64: 1, 10>}, {transform_indices = @transform_15, window_bounds = array<i64: 1, 1, 10>}]} {
    %c0 = arith.constant 0 : index
    %c0_0 = arith.constant 0 : index
    %c0_1 = arith.constant 0 : index
    %0 = vector.load %arg1[%c0, %c0_0, %c0_1] : memref<1x32x96xf32, #tpu.memory_space<vmem>>, vector<1x32x96xf32>
    %c0_2 = arith.constant 0 : index
    %c0_3 = arith.constant 0 : index
    %1 = vector.load %arg3[%c0_2, %c0_3] : memref<1x168xf32, #tpu.memory_space<vmem>>, vector<1x168xf32>
    %cst = arith.constant 0.000000e+00 : f32
    %2 = vector.broadcast %cst : f32 to vector<1x28x168xf32>
    %3 = vector.extract_strided_slice %0 {offsets = [0, 0, 0], sizes = [1, 28, 96], strides = [1, 1, 1]} : vector<1x32x96xf32> to vector<1x28x96xf32>
    %c0_4 = arith.constant 0 : index
    %c0_5 = arith.constant 0 : index
    %c0_6 = arith.constant 0 : index
    %4 = vector.load %arg2[%c0_4, %c0_5, %c0_6] : memref<5x96x168xf32, #tpu.memory_space<vmem>>, vector<1x96x168xf32>
    %5 = vector.shape_cast %4 : vector<1x96x168xf32> to vector<96x168xf32>
    %6 = arith.truncf %3 : vector<1x28x96xf32> to vector<1x28x96xbf16>
    %7 = arith.truncf %5 : vector<96x168xf32> to vector<96x168xbf16>
    %8 = vector.shape_cast %7 : vector<96x168xbf16> to vector<1x96x168xbf16>
    "tpu.trace_start"() <{level = 10 : i32, message = "bmk,bkn->bmn"}> : () -> ()
    %cst_7 = arith.constant dense<0.000000e+00> : vector<1x28x168xf32>
    %9 = tpu.matmul %6, %8, %cst_7 {dimension_numbers = #tpu.dot_dimension_numbers<[2], [1], [1], [2], [0, 0, 0, 1, 1, 2], [0], [0]>} : vector<1x28x96xbf16>, vector<1x96x168xbf16>, vector<1x28x168xf32> -> vector<1x28x168xf32>
    "tpu.trace_stop"() : () -> ()
    %10 = arith.addf %2, %9 : vector<1x28x168xf32>
    %11 = vector.extract_strided_slice %0 {offsets = [0, 1, 0], sizes = [1, 28, 96], strides = [1, 1, 1]} : vector<1x32x96xf32> to vector<1x28x96xf32>
    %c1 = arith.constant 1 : index
    %c0_8 = arith.constant 0 : index
    %c0_9 = arith.constant 0 : index
    %12 = vector.load %arg2[%c1, %c0_8, %c0_9] : memref<5x96x168xf32, #tpu.memory_space<vmem>>, vector<1x96x168xf32>
    %13 = vector.shape_cast %12 : vector<1x96x168xf32> to vector<96x168xf32>
    %14 = arith.truncf %11 : vector<1x28x96xf32> to vector<1x28x96xbf16>
    %15 = arith.truncf %13 : vector<96x168xf32> to vector<96x168xbf16>
    %16 = vector.shape_cast %15 : vector<96x168xbf16> to vector<1x96x168xbf16>
    "tpu.trace_start"() <{level = 10 : i32, message = "bmk,bkn->bmn"}> : () -> ()
    %cst_10 = arith.constant dense<0.000000e+00> : vector<1x28x168xf32>
    %17 = tpu.matmul %14, %16, %cst_10 {dimension_numbers = #tpu.dot_dimension_numbers<[2], [1], [1], [2], [0, 0, 0, 1, 1, 2], [0], [0]>} : vector<1x28x96xbf16>, vector<1x96x168xbf16>, vector<1x28x168xf32> -> vector<1x28x168xf32>
    "tpu.trace_stop"() : () -> ()
    %18 = arith.addf %10, %17 : vector<1x28x168xf32>
    %19 = vector.extract_strided_slice %0 {offsets = [0, 2, 0], sizes = [1, 28, 96], strides = [1, 1, 1]} : vector<1x32x96xf32> to vector<1x28x96xf32>
    %c2 = arith.constant 2 : index
    %c0_11 = arith.constant 0 : index
    %c0_12 = arith.constant 0 : index
    %20 = vector.load %arg2[%c2, %c0_11, %c0_12] : memref<5x96x168xf32, #tpu.memory_space<vmem>>, vector<1x96x168xf32>
    %21 = vector.shape_cast %20 : vector<1x96x168xf32> to vector<96x168xf32>
    %22 = arith.truncf %19 : vector<1x28x96xf32> to vector<1x28x96xbf16>
    %23 = arith.truncf %21 : vector<96x168xf32> to vector<96x168xbf16>
    %24 = vector.shape_cast %23 : vector<96x168xbf16> to vector<1x96x168xbf16>
    "tpu.trace_start"() <{level = 10 : i32, message = "bmk,bkn->bmn"}> : () -> ()
    %cst_13 = arith.constant dense<0.000000e+00> : vector<1x28x168xf32>
    %25 = tpu.matmul %22, %24, %cst_13 {dimension_numbers = #tpu.dot_dimension_numbers<[2], [1], [1], [2], [0, 0, 0, 1, 1, 2], [0], [0]>} : vector<1x28x96xbf16>, vector<1x96x168xbf16>, vector<1x28x168xf32> -> vector<1x28x168xf32>
    "tpu.trace_stop"() : () -> ()
    %26 = arith.addf %18, %25 : vector<1x28x168xf32>
    %27 = vector.extract_strided_slice %0 {offsets = [0, 3, 0], sizes = [1, 28, 96], strides = [1, 1, 1]} : vector<1x32x96xf32> to vector<1x28x96xf32>
    %c3 = arith.constant 3 : index
    %c0_14 = arith.constant 0 : index
    %c0_15 = arith.constant 0 : index
    %28 = vector.load %arg2[%c3, %c0_14, %c0_15] : memref<5x96x168xf32, #tpu.memory_space<vmem>>, vector<1x96x168xf32>
    %29 = vector.shape_cast %28 : vector<1x96x168xf32> to vector<96x168xf32>
    %30 = arith.truncf %27 : vector<1x28x96xf32> to vector<1x28x96xbf16>
    %31 = arith.truncf %29 : vector<96x168xf32> to vector<96x168xbf16>
    %32 = vector.shape_cast %31 : vector<96x168xbf16> to vector<1x96x168xbf16>
    "tpu.trace_start"() <{level = 10 : i32, message = "bmk,bkn->bmn"}> : () -> ()
    %cst_16 = arith.constant dense<0.000000e+00> : vector<1x28x168xf32>
    %33 = tpu.matmul %30, %32, %cst_16 {dimension_numbers = #tpu.dot_dimension_numbers<[2], [1], [1], [2], [0, 0, 0, 1, 1, 2], [0], [0]>} : vector<1x28x96xbf16>, vector<1x96x168xbf16>, vector<1x28x168xf32> -> vector<1x28x168xf32>
    "tpu.trace_stop"() : () -> ()
    %34 = arith.addf %26, %33 : vector<1x28x168xf32>
    %35 = vector.extract_strided_slice %0 {offsets = [0, 4, 0], sizes = [1, 28, 96], strides = [1, 1, 1]} : vector<1x32x96xf32> to vector<1x28x96xf32>
    %c4 = arith.constant 4 : index
    %c0_17 = arith.constant 0 : index
    %c0_18 = arith.constant 0 : index
    %36 = vector.load %arg2[%c4, %c0_17, %c0_18] : memref<5x96x168xf32, #tpu.memory_space<vmem>>, vector<1x96x168xf32>
    %37 = vector.shape_cast %36 : vector<1x96x168xf32> to vector<96x168xf32>
    %38 = arith.truncf %35 : vector<1x28x96xf32> to vector<1x28x96xbf16>
    %39 = arith.truncf %37 : vector<96x168xf32> to vector<96x168xbf16>
    %40 = vector.shape_cast %39 : vector<96x168xbf16> to vector<1x96x168xbf16>
    "tpu.trace_start"() <{level = 10 : i32, message = "bmk,bkn->bmn"}> : () -> ()
    %cst_19 = arith.constant dense<0.000000e+00> : vector<1x28x168xf32>
    %41 = tpu.matmul %38, %40, %cst_19 {dimension_numbers = #tpu.dot_dimension_numbers<[2], [1], [1], [2], [0, 0, 0, 1, 1, 2], [0], [0]>} : vector<1x28x96xbf16>, vector<1x96x168xbf16>, vector<1x28x168xf32> -> vector<1x28x168xf32>
    "tpu.trace_stop"() : () -> ()
    %42 = arith.addf %34, %41 : vector<1x28x168xf32>
    %43 = vector.shape_cast %1 : vector<1x168xf32> to vector<1x1x168xf32>
    %44 = vector.broadcast %43 : vector<1x1x168xf32> to vector<1x28x168xf32>
    %45 = arith.addf %42, %44 : vector<1x28x168xf32>
    %cst_20 = arith.constant 0.000000e+00 : f32
    %46 = vector.broadcast %cst_20 : f32 to vector<1x28x168xf32>
    %47 = arith.maximumf %45, %46 : vector<1x28x168xf32>
    %c0_21 = arith.constant 0 : index
    %c0_22 = arith.constant 0 : index
    %c0_23 = arith.constant 0 : index
    %48 = vector.load %arg4[%c0_21, %c0_22, %c0_23] : memref<2x14x28xf32, #tpu.memory_space<vmem>>, vector<1x14x28xf32>
    %49 = vector.shape_cast %48 : vector<1x14x28xf32> to vector<14x28xf32>
    %50 = vector.shape_cast %49 : vector<14x28xf32> to vector<1x14x28xf32>
    "tpu.trace_start"() <{level = 10 : i32, message = "bsm,bmk->bsk"}> : () -> ()
    %cst_24 = arith.constant dense<0.000000e+00> : vector<1x14x168xf32>
    %51 = tpu.matmul %50, %47, %cst_24 {dimension_numbers = #tpu.dot_dimension_numbers<[2], [1], [1], [2], [0, 0, 0, 1, 1, 2], [0], [0]>} : vector<1x14x28xf32>, vector<1x28x168xf32>, vector<1x14x168xf32> -> vector<1x14x168xf32>
    "tpu.trace_stop"() : () -> ()
    %c1_25 = arith.constant 1 : index
    %c0_26 = arith.constant 0 : index
    %c0_27 = arith.constant 0 : index
    %52 = vector.load %arg4[%c1_25, %c0_26, %c0_27] : memref<2x14x28xf32, #tpu.memory_space<vmem>>, vector<1x14x28xf32>
    %53 = vector.shape_cast %52 : vector<1x14x28xf32> to vector<14x28xf32>
    %54 = vector.shape_cast %53 : vector<14x28xf32> to vector<1x14x28xf32>
    "tpu.trace_start"() <{level = 10 : i32, message = "bsm,bmk->bsk"}> : () -> ()
    %cst_28 = arith.constant dense<0.000000e+00> : vector<1x14x168xf32>
    %55 = tpu.matmul %54, %47, %cst_28 {dimension_numbers = #tpu.dot_dimension_numbers<[2], [1], [1], [2], [0, 0, 0, 1, 1, 2], [0], [0]>} : vector<1x14x28xf32>, vector<1x28x168xf32>, vector<1x14x168xf32> -> vector<1x14x168xf32>
    "tpu.trace_stop"() : () -> ()
    %56 = arith.maximumf %51, %55 : vector<1x14x168xf32>
    %c0_29 = arith.constant 0 : index
    %c0_30 = arith.constant 0 : index
    %c0_31 = arith.constant 0 : index
    %57 = vector.load %arg5[%c0_29, %c0_30, %c0_31] : memref<2x168x84xf32, #tpu.memory_space<vmem>>, vector<1x168x84xf32>
    %58 = vector.shape_cast %57 : vector<1x168x84xf32> to vector<168x84xf32>
    %59 = vector.shape_cast %58 : vector<168x84xf32> to vector<1x168x84xf32>
    "tpu.trace_start"() <{level = 10 : i32, message = "bmk,bkn->bmn"}> : () -> ()
    %cst_32 = arith.constant dense<0.000000e+00> : vector<1x14x84xf32>
    %60 = tpu.matmul %56, %59, %cst_32 {dimension_numbers = #tpu.dot_dimension_numbers<[2], [1], [1], [2], [0, 0, 0, 1, 1, 2], [0], [0]>} : vector<1x14x168xf32>, vector<1x168x84xf32>, vector<1x14x84xf32> -> vector<1x14x84xf32>
    "tpu.trace_stop"() : () -> ()
    %c1_33 = arith.constant 1 : index
    %c0_34 = arith.constant 0 : index
    %c0_35 = arith.constant 0 : index
    %61 = vector.load %arg5[%c1_33, %c0_34, %c0_35] : memref<2x168x84xf32, #tpu.memory_space<vmem>>, vector<1x168x84xf32>
    %62 = vector.shape_cast %61 : vector<1x168x84xf32> to vector<168x84xf32>
    %63 = vector.shape_cast %62 : vector<168x84xf32> to vector<1x168x84xf32>
    "tpu.trace_start"() <{level = 10 : i32, message = "bmk,bkn->bmn"}> : () -> ()
    %cst_36 = arith.constant dense<0.000000e+00> : vector<1x14x84xf32>
    %64 = tpu.matmul %56, %63, %cst_36 {dimension_numbers = #tpu.dot_dimension_numbers<[2], [1], [1], [2], [0, 0, 0, 1, 1, 2], [0], [0]>} : vector<1x14x168xf32>, vector<1x168x84xf32>, vector<1x14x84xf32> -> vector<1x14x84xf32>
    "tpu.trace_stop"() : () -> ()
    %65 = arith.maximumf %60, %64 : vector<1x14x84xf32>
    %c0_37 = arith.constant 0 : index
    %c0_38 = arith.constant 0 : index
    %66 = vector.load %arg7[%c0_37, %c0_38] : memref<1x160xf32, #tpu.memory_space<vmem>>, vector<1x160xf32>
    %cst_39 = arith.constant 0.000000e+00 : f32
    %67 = vector.broadcast %cst_39 : f32 to vector<1x10x160xf32>
    %68 = vector.extract_strided_slice %65 {offsets = [0, 0, 0], sizes = [1, 10, 84], strides = [1, 1, 1]} : vector<1x14x84xf32> to vector<1x10x84xf32>
    %c0_40 = arith.constant 0 : index
    %c0_41 = arith.constant 0 : index
    %c0_42 = arith.constant 0 : index
    %69 = vector.load %arg6[%c0_40, %c0_41, %c0_42] : memref<5x84x160xf32, #tpu.memory_space<vmem>>, vector<1x84x160xf32>
    %70 = vector.shape_cast %69 : vector<1x84x160xf32> to vector<84x160xf32>
    %71 = arith.truncf %68 : vector<1x10x84xf32> to vector<1x10x84xbf16>
    %72 = arith.truncf %70 : vector<84x160xf32> to vector<84x160xbf16>
    %73 = vector.shape_cast %72 : vector<84x160xbf16> to vector<1x84x160xbf16>
    "tpu.trace_start"() <{level = 10 : i32, message = "bmk,bkn->bmn"}> : () -> ()
    %cst_43 = arith.constant dense<0.000000e+00> : vector<1x10x160xf32>
    %74 = tpu.matmul %71, %73, %cst_43 {dimension_numbers = #tpu.dot_dimension_numbers<[2], [1], [1], [2], [0, 0, 0, 1, 1, 2], [0], [0]>} : vector<1x10x84xbf16>, vector<1x84x160xbf16>, vector<1x10x160xf32> -> vector<1x10x160xf32>
    "tpu.trace_stop"() : () -> ()
    %75 = arith.addf %67, %74 : vector<1x10x160xf32>
    %76 = vector.extract_strided_slice %65 {offsets = [0, 1, 0], sizes = [1, 10, 84], strides = [1, 1, 1]} : vector<1x14x84xf32> to vector<1x10x84xf32>
    %c1_44 = arith.constant 1 : index
    %c0_45 = arith.constant 0 : index
    %c0_46 = arith.constant 0 : index
    %77 = vector.load %arg6[%c1_44, %c0_45, %c0_46] : memref<5x84x160xf32, #tpu.memory_space<vmem>>, vector<1x84x160xf32>
    %78 = vector.shape_cast %77 : vector<1x84x160xf32> to vector<84x160xf32>
    %79 = arith.truncf %76 : vector<1x10x84xf32> to vector<1x10x84xbf16>
    %80 = arith.truncf %78 : vector<84x160xf32> to vector<84x160xbf16>
    %81 = vector.shape_cast %80 : vector<84x160xbf16> to vector<1x84x160xbf16>
    "tpu.trace_start"() <{level = 10 : i32, message = "bmk,bkn->bmn"}> : () -> ()
    %cst_47 = arith.constant dense<0.000000e+00> : vector<1x10x160xf32>
    %82 = tpu.matmul %79, %81, %cst_47 {dimension_numbers = #tpu.dot_dimension_numbers<[2], [1], [1], [2], [0, 0, 0, 1, 1, 2], [0], [0]>} : vector<1x10x84xbf16>, vector<1x84x160xbf16>, vector<1x10x160xf32> -> vector<1x10x160xf32>
    "tpu.trace_stop"() : () -> ()
    %83 = arith.addf %75, %82 : vector<1x10x160xf32>
    %84 = vector.extract_strided_slice %65 {offsets = [0, 2, 0], sizes = [1, 10, 84], strides = [1, 1, 1]} : vector<1x14x84xf32> to vector<1x10x84xf32>
    %c2_48 = arith.constant 2 : index
    %c0_49 = arith.constant 0 : index
    %c0_50 = arith.constant 0 : index
    %85 = vector.load %arg6[%c2_48, %c0_49, %c0_50] : memref<5x84x160xf32, #tpu.memory_space<vmem>>, vector<1x84x160xf32>
    %86 = vector.shape_cast %85 : vector<1x84x160xf32> to vector<84x160xf32>
    %87 = arith.truncf %84 : vector<1x10x84xf32> to vector<1x10x84xbf16>
    %88 = arith.truncf %86 : vector<84x160xf32> to vector<84x160xbf16>
    %89 = vector.shape_cast %88 : vector<84x160xbf16> to vector<1x84x160xbf16>
    "tpu.trace_start"() <{level = 10 : i32, message = "bmk,bkn->bmn"}> : () -> ()
    %cst_51 = arith.constant dense<0.000000e+00> : vector<1x10x160xf32>
    %90 = tpu.matmul %87, %89, %cst_51 {dimension_numbers = #tpu.dot_dimension_numbers<[2], [1], [1], [2], [0, 0, 0, 1, 1, 2], [0], [0]>} : vector<1x10x84xbf16>, vector<1x84x160xbf16>, vector<1x10x160xf32> -> vector<1x10x160xf32>
    "tpu.trace_stop"() : () -> ()
    %91 = arith.addf %83, %90 : vector<1x10x160xf32>
    %92 = vector.extract_strided_slice %65 {offsets = [0, 3, 0], sizes = [1, 10, 84], strides = [1, 1, 1]} : vector<1x14x84xf32> to vector<1x10x84xf32>
    %c3_52 = arith.constant 3 : index
    %c0_53 = arith.constant 0 : index
    %c0_54 = arith.constant 0 : index
    %93 = vector.load %arg6[%c3_52, %c0_53, %c0_54] : memref<5x84x160xf32, #tpu.memory_space<vmem>>, vector<1x84x160xf32>
    %94 = vector.shape_cast %93 : vector<1x84x160xf32> to vector<84x160xf32>
    %95 = arith.truncf %92 : vector<1x10x84xf32> to vector<1x10x84xbf16>
    %96 = arith.truncf %94 : vector<84x160xf32> to vector<84x160xbf16>
    %97 = vector.shape_cast %96 : vector<84x160xbf16> to vector<1x84x160xbf16>
    "tpu.trace_start"() <{level = 10 : i32, message = "bmk,bkn->bmn"}> : () -> ()
    %cst_55 = arith.constant dense<0.000000e+00> : vector<1x10x160xf32>
    %98 = tpu.matmul %95, %97, %cst_55 {dimension_numbers = #tpu.dot_dimension_numbers<[2], [1], [1], [2], [0, 0, 0, 1, 1, 2], [0], [0]>} : vector<1x10x84xbf16>, vector<1x84x160xbf16>, vector<1x10x160xf32> -> vector<1x10x160xf32>
    "tpu.trace_stop"() : () -> ()
    %99 = arith.addf %91, %98 : vector<1x10x160xf32>
    %100 = vector.extract_strided_slice %65 {offsets = [0, 4, 0], sizes = [1, 10, 84], strides = [1, 1, 1]} : vector<1x14x84xf32> to vector<1x10x84xf32>
    %c4_56 = arith.constant 4 : index
    %c0_57 = arith.constant 0 : index
    %c0_58 = arith.constant 0 : index
    %101 = vector.load %arg6[%c4_56, %c0_57, %c0_58] : memref<5x84x160xf32, #tpu.memory_space<vmem>>, vector<1x84x160xf32>
    %102 = vector.shape_cast %101 : vector<1x84x160xf32> to vector<84x160xf32>
    %103 = arith.truncf %100 : vector<1x10x84xf32> to vector<1x10x84xbf16>
    %104 = arith.truncf %102 : vector<84x160xf32> to vector<84x160xbf16>
    %105 = vector.shape_cast %104 : vector<84x160xbf16> to vector<1x84x160xbf16>
    "tpu.trace_start"() <{level = 10 : i32, message = "bmk,bkn->bmn"}> : () -> ()
    %cst_59 = arith.constant dense<0.000000e+00> : vector<1x10x160xf32>
    %106 = tpu.matmul %103, %105, %cst_59 {dimension_numbers = #tpu.dot_dimension_numbers<[2], [1], [1], [2], [0, 0, 0, 1, 1, 2], [0], [0]>} : vector<1x10x84xbf16>, vector<1x84x160xbf16>, vector<1x10x160xf32> -> vector<1x10x160xf32>
    "tpu.trace_stop"() : () -> ()
    %107 = arith.addf %99, %106 : vector<1x10x160xf32>
    %108 = vector.shape_cast %66 : vector<1x160xf32> to vector<1x1x160xf32>
    %109 = vector.broadcast %108 : vector<1x1x160xf32> to vector<1x10x160xf32>
    %110 = arith.addf %107, %109 : vector<1x10x160xf32>
    %cst_60 = arith.constant 0.000000e+00 : f32
    %111 = vector.broadcast %cst_60 : f32 to vector<1x10x160xf32>
    %112 = arith.maximumf %110, %111 : vector<1x10x160xf32>
    %c0_61 = arith.constant 0 : index
    %c0_62 = arith.constant 0 : index
    %c0_63 = arith.constant 0 : index
    %113 = vector.load %arg8[%c0_61, %c0_62, %c0_63] : memref<2x5x10xf32, #tpu.memory_space<vmem>>, vector<1x5x10xf32>
    %114 = vector.shape_cast %113 : vector<1x5x10xf32> to vector<5x10xf32>
    %115 = vector.shape_cast %114 : vector<5x10xf32> to vector<1x5x10xf32>
    "tpu.trace_start"() <{level = 10 : i32, message = "bsm,bmk->bsk"}> : () -> ()
    %cst_64 = arith.constant dense<0.000000e+00> : vector<1x5x160xf32>
    %116 = tpu.matmul %115, %112, %cst_64 {dimension_numbers = #tpu.dot_dimension_numbers<[2], [1], [1], [2], [0, 0, 0, 1, 1, 2], [0], [0]>} : vector<1x5x10xf32>, vector<1x10x160xf32>, vector<1x5x160xf32> -> vector<1x5x160xf32>
    "tpu.trace_stop"() : () -> ()
    %c1_65 = arith.constant 1 : index
    %c0_66 = arith.constant 0 : index
    %c0_67 = arith.constant 0 : index
    %117 = vector.load %arg8[%c1_65, %c0_66, %c0_67] : memref<2x5x10xf32, #tpu.memory_space<vmem>>, vector<1x5x10xf32>
    %118 = vector.shape_cast %117 : vector<1x5x10xf32> to vector<5x10xf32>
    %119 = vector.shape_cast %118 : vector<5x10xf32> to vector<1x5x10xf32>
    "tpu.trace_start"() <{level = 10 : i32, message = "bsm,bmk->bsk"}> : () -> ()
    %cst_68 = arith.constant dense<0.000000e+00> : vector<1x5x160xf32>
    %120 = tpu.matmul %119, %112, %cst_68 {dimension_numbers = #tpu.dot_dimension_numbers<[2], [1], [1], [2], [0, 0, 0, 1, 1, 2], [0], [0]>} : vector<1x5x10xf32>, vector<1x10x160xf32>, vector<1x5x160xf32> -> vector<1x5x160xf32>
    "tpu.trace_stop"() : () -> ()
    %121 = arith.maximumf %116, %120 : vector<1x5x160xf32>
    %c0_69 = arith.constant 0 : index
    %c0_70 = arith.constant 0 : index
    %c0_71 = arith.constant 0 : index
    %122 = vector.load %arg9[%c0_69, %c0_70, %c0_71] : memref<2x160x80xf32, #tpu.memory_space<vmem>>, vector<1x160x80xf32>
    %123 = vector.shape_cast %122 : vector<1x160x80xf32> to vector<160x80xf32>
    %124 = vector.shape_cast %123 : vector<160x80xf32> to vector<1x160x80xf32>
    "tpu.trace_start"() <{level = 10 : i32, message = "bmk,bkn->bmn"}> : () -> ()
    %cst_72 = arith.constant dense<0.000000e+00> : vector<1x5x80xf32>
    %125 = tpu.matmul %121, %124, %cst_72 {dimension_numbers = #tpu.dot_dimension_numbers<[2], [1], [1], [2], [0, 0, 0, 1, 1, 2], [0], [0]>} : vector<1x5x160xf32>, vector<1x160x80xf32>, vector<1x5x80xf32> -> vector<1x5x80xf32>
    "tpu.trace_stop"() : () -> ()
    %c1_73 = arith.constant 1 : index
    %c0_74 = arith.constant 0 : index
    %c0_75 = arith.constant 0 : index
    %126 = vector.load %arg9[%c1_73, %c0_74, %c0_75] : memref<2x160x80xf32, #tpu.memory_space<vmem>>, vector<1x160x80xf32>
    %127 = vector.shape_cast %126 : vector<1x160x80xf32> to vector<160x80xf32>
    %128 = vector.shape_cast %127 : vector<160x80xf32> to vector<1x160x80xf32>
    "tpu.trace_start"() <{level = 10 : i32, message = "bmk,bkn->bmn"}> : () -> ()
    %cst_76 = arith.constant dense<0.000000e+00> : vector<1x5x80xf32>
    %129 = tpu.matmul %121, %128, %cst_76 {dimension_numbers = #tpu.dot_dimension_numbers<[2], [1], [1], [2], [0, 0, 0, 1, 1, 2], [0], [0]>} : vector<1x5x160xf32>, vector<1x160x80xf32>, vector<1x5x80xf32> -> vector<1x5x80xf32>
    "tpu.trace_stop"() : () -> ()
    %130 = arith.maximumf %125, %129 : vector<1x5x80xf32>
    %cst_77 = arith.constant 0.000000e+00 : f32
    %131 = vector.broadcast %cst_77 : f32 to vector<1x1x120xf32>
    %132 = vector.extract_strided_slice %130 {offsets = [0, 0, 0], sizes = [1, 1, 80], strides = [1, 1, 1]} : vector<1x5x80xf32> to vector<1x1x80xf32>
    %c0_78 = arith.constant 0 : index
    %c0_79 = arith.constant 0 : index
    %c0_80 = arith.constant 0 : index
    %133 = vector.load %arg10[%c0_78, %c0_79, %c0_80] : memref<5x80x120xf32, #tpu.memory_space<vmem>>, vector<1x80x120xf32>
    %134 = vector.shape_cast %133 : vector<1x80x120xf32> to vector<80x120xf32>
    %135 = arith.truncf %132 : vector<1x1x80xf32> to vector<1x1x80xbf16>
    %136 = arith.truncf %134 : vector<80x120xf32> to vector<80x120xbf16>
    %137 = vector.shape_cast %136 : vector<80x120xbf16> to vector<1x80x120xbf16>
    "tpu.trace_start"() <{level = 10 : i32, message = "bmk,bkn->bmn"}> : () -> ()
    %cst_81 = arith.constant dense<0.000000e+00> : vector<1x1x120xf32>
    %138 = tpu.matmul %135, %137, %cst_81 {dimension_numbers = #tpu.dot_dimension_numbers<[2], [1], [1], [2], [0, 0, 0, 1, 1, 2], [0], [0]>} : vector<1x1x80xbf16>, vector<1x80x120xbf16>, vector<1x1x120xf32> -> vector<1x1x120xf32>
    "tpu.trace_stop"() : () -> ()
    %139 = arith.addf %131, %138 : vector<1x1x120xf32>
    %140 = vector.extract_strided_slice %130 {offsets = [0, 1, 0], sizes = [1, 1, 80], strides = [1, 1, 1]} : vector<1x5x80xf32> to vector<1x1x80xf32>
    %c1_82 = arith.constant 1 : index
    %c0_83 = arith.constant 0 : index
    %c0_84 = arith.constant 0 : index
    %141 = vector.load %arg10[%c1_82, %c0_83, %c0_84] : memref<5x80x120xf32, #tpu.memory_space<vmem>>, vector<1x80x120xf32>
    %142 = vector.shape_cast %141 : vector<1x80x120xf32> to vector<80x120xf32>
    %143 = arith.truncf %140 : vector<1x1x80xf32> to vector<1x1x80xbf16>
    %144 = arith.truncf %142 : vector<80x120xf32> to vector<80x120xbf16>
    %145 = vector.shape_cast %144 : vector<80x120xbf16> to vector<1x80x120xbf16>
    "tpu.trace_start"() <{level = 10 : i32, message = "bmk,bkn->bmn"}> : () -> ()
    %cst_85 = arith.constant dense<0.000000e+00> : vector<1x1x120xf32>
    %146 = tpu.matmul %143, %145, %cst_85 {dimension_numbers = #tpu.dot_dimension_numbers<[2], [1], [1], [2], [0, 0, 0, 1, 1, 2], [0], [0]>} : vector<1x1x80xbf16>, vector<1x80x120xbf16>, vector<1x1x120xf32> -> vector<1x1x120xf32>
    "tpu.trace_stop"() : () -> ()
    %147 = arith.addf %139, %146 : vector<1x1x120xf32>
    %148 = vector.extract_strided_slice %130 {offsets = [0, 2, 0], sizes = [1, 1, 80], strides = [1, 1, 1]} : vector<1x5x80xf32> to vector<1x1x80xf32>
    %c2_86 = arith.constant 2 : index
    %c0_87 = arith.constant 0 : index
    %c0_88 = arith.constant 0 : index
    %149 = vector.load %arg10[%c2_86, %c0_87, %c0_88] : memref<5x80x120xf32, #tpu.memory_space<vmem>>, vector<1x80x120xf32>
    %150 = vector.shape_cast %149 : vector<1x80x120xf32> to vector<80x120xf32>
    %151 = arith.truncf %148 : vector<1x1x80xf32> to vector<1x1x80xbf16>
    %152 = arith.truncf %150 : vector<80x120xf32> to vector<80x120xbf16>
    %153 = vector.shape_cast %152 : vector<80x120xbf16> to vector<1x80x120xbf16>
    "tpu.trace_start"() <{level = 10 : i32, message = "bmk,bkn->bmn"}> : () -> ()
    %cst_89 = arith.constant dense<0.000000e+00> : vector<1x1x120xf32>
    %154 = tpu.matmul %151, %153, %cst_89 {dimension_numbers = #tpu.dot_dimension_numbers<[2], [1], [1], [2], [0, 0, 0, 1, 1, 2], [0], [0]>} : vector<1x1x80xbf16>, vector<1x80x120xbf16>, vector<1x1x120xf32> -> vector<1x1x120xf32>
    "tpu.trace_stop"() : () -> ()
    %155 = arith.addf %147, %154 : vector<1x1x120xf32>
    %156 = vector.extract_strided_slice %130 {offsets = [0, 3, 0], sizes = [1, 1, 80], strides = [1, 1, 1]} : vector<1x5x80xf32> to vector<1x1x80xf32>
    %c3_90 = arith.constant 3 : index
    %c0_91 = arith.constant 0 : index
    %c0_92 = arith.constant 0 : index
    %157 = vector.load %arg10[%c3_90, %c0_91, %c0_92] : memref<5x80x120xf32, #tpu.memory_space<vmem>>, vector<1x80x120xf32>
    %158 = vector.shape_cast %157 : vector<1x80x120xf32> to vector<80x120xf32>
    %159 = arith.truncf %156 : vector<1x1x80xf32> to vector<1x1x80xbf16>
    %160 = arith.truncf %158 : vector<80x120xf32> to vector<80x120xbf16>
    %161 = vector.shape_cast %160 : vector<80x120xbf16> to vector<1x80x120xbf16>
    "tpu.trace_start"() <{level = 10 : i32, message = "bmk,bkn->bmn"}> : () -> ()
    %cst_93 = arith.constant dense<0.000000e+00> : vector<1x1x120xf32>
    %162 = tpu.matmul %159, %161, %cst_93 {dimension_numbers = #tpu.dot_dimension_numbers<[2], [1], [1], [2], [0, 0, 0, 1, 1, 2], [0], [0]>} : vector<1x1x80xbf16>, vector<1x80x120xbf16>, vector<1x1x120xf32> -> vector<1x1x120xf32>
    "tpu.trace_stop"() : () -> ()
    %163 = arith.addf %155, %162 : vector<1x1x120xf32>
    %164 = vector.extract_strided_slice %130 {offsets = [0, 4, 0], sizes = [1, 1, 80], strides = [1, 1, 1]} : vector<1x5x80xf32> to vector<1x1x80xf32>
    %c4_94 = arith.constant 4 : index
    %c0_95 = arith.constant 0 : index
    %c0_96 = arith.constant 0 : index
    %165 = vector.load %arg10[%c4_94, %c0_95, %c0_96] : memref<5x80x120xf32, #tpu.memory_space<vmem>>, vector<1x80x120xf32>
    %166 = vector.shape_cast %165 : vector<1x80x120xf32> to vector<80x120xf32>
    %167 = arith.truncf %164 : vector<1x1x80xf32> to vector<1x1x80xbf16>
    %168 = arith.truncf %166 : vector<80x120xf32> to vector<80x120xbf16>
    %169 = vector.shape_cast %168 : vector<80x120xbf16> to vector<1x80x120xbf16>
    "tpu.trace_start"() <{level = 10 : i32, message = "bmk,bkn->bmn"}> : () -> ()
    %cst_97 = arith.constant dense<0.000000e+00> : vector<1x1x120xf32>
    %170 = tpu.matmul %167, %169, %cst_97 {dimension_numbers = #tpu.dot_dimension_numbers<[2], [1], [1], [2], [0, 0, 0, 1, 1, 2], [0], [0]>} : vector<1x1x80xbf16>, vector<1x80x120xbf16>, vector<1x1x120xf32> -> vector<1x1x120xf32>
    "tpu.trace_stop"() : () -> ()
    %171 = arith.addf %163, %170 : vector<1x1x120xf32>
    %c0_98 = arith.constant 0 : index
    %c0_99 = arith.constant 0 : index
    %172 = vector.load %arg11[%c0_98, %c0_99] : memref<1x120xf32, #tpu.memory_space<vmem>>, vector<1x120xf32>
    %173 = vector.shape_cast %172 : vector<1x120xf32> to vector<1x1x120xf32>
    %174 = arith.addf %171, %173 : vector<1x1x120xf32>
    %cst_100 = arith.constant 0.000000e+00 : f32
    %175 = vector.broadcast %cst_100 : f32 to vector<1x1x120xf32>
    %176 = arith.maximumf %174, %175 : vector<1x1x120xf32>
    %c0_101 = arith.constant 0 : index
    %c0_102 = arith.constant 0 : index
    %177 = vector.load %arg12[%c0_101, %c0_102] : memref<120x84xf32, #tpu.memory_space<vmem>>, vector<120x84xf32>
    %178 = arith.truncf %176 : vector<1x1x120xf32> to vector<1x1x120xbf16>
    %179 = arith.truncf %177 : vector<120x84xf32> to vector<120x84xbf16>
    %180 = vector.shape_cast %179 : vector<120x84xbf16> to vector<1x120x84xbf16>
    "tpu.trace_start"() <{level = 10 : i32, message = "bmk,bkn->bmn"}> : () -> ()
    %cst_103 = arith.constant dense<0.000000e+00> : vector<1x1x84xf32>
    %181 = tpu.matmul %178, %180, %cst_103 {dimension_numbers = #tpu.dot_dimension_numbers<[2], [1], [1], [2], [0, 0, 0, 1, 1, 2], [0], [0]>} : vector<1x1x120xbf16>, vector<1x120x84xbf16>, vector<1x1x84xf32> -> vector<1x1x84xf32>
    "tpu.trace_stop"() : () -> ()
    %c0_104 = arith.constant 0 : index
    %c0_105 = arith.constant 0 : index
    %182 = vector.load %arg13[%c0_104, %c0_105] : memref<1x84xf32, #tpu.memory_space<vmem>>, vector<1x84xf32>
    %183 = vector.shape_cast %182 : vector<1x84xf32> to vector<1x1x84xf32>
    %184 = arith.addf %181, %183 : vector<1x1x84xf32>
    %cst_106 = arith.constant 0.000000e+00 : f32
    %185 = vector.broadcast %cst_106 : f32 to vector<1x1x84xf32>
    %186 = arith.maximumf %184, %185 : vector<1x1x84xf32>
    %c0_107 = arith.constant 0 : index
    %c0_108 = arith.constant 0 : index
    %187 = vector.load %arg14[%c0_107, %c0_108] : memref<84x10xf32, #tpu.memory_space<vmem>>, vector<84x10xf32>
    %188 = arith.truncf %186 : vector<1x1x84xf32> to vector<1x1x84xbf16>
    %189 = arith.truncf %187 : vector<84x10xf32> to vector<84x10xbf16>
    %190 = vector.shape_cast %189 : vector<84x10xbf16> to vector<1x84x10xbf16>
    "tpu.trace_start"() <{level = 10 : i32, message = "bmk,bkn->bmn"}> : () -> ()
    %cst_109 = arith.constant dense<0.000000e+00> : vector<1x1x10xf32>
    %191 = tpu.matmul %188, %190, %cst_109 {dimension_numbers = #tpu.dot_dimension_numbers<[2], [1], [1], [2], [0, 0, 0, 1, 1, 2], [0], [0]>} : vector<1x1x84xbf16>, vector<1x84x10xbf16>, vector<1x1x10xf32> -> vector<1x1x10xf32>
    "tpu.trace_stop"() : () -> ()
    %c0_110 = arith.constant 0 : index
    %c0_111 = arith.constant 0 : index
    %192 = vector.load %arg15[%c0_110, %c0_111] : memref<1x10xf32, #tpu.memory_space<vmem>>, vector<1x10xf32>
    %193 = vector.shape_cast %192 : vector<1x10xf32> to vector<1x1x10xf32>
    %194 = arith.addf %191, %193 : vector<1x1x10xf32>
    %c0_112 = arith.constant 0 : index
    %c0_113 = arith.constant 0 : index
    %c0_114 = arith.constant 0 : index
    %195 = vector.load %arg16[%c0_112, %c0_113, %c0_114] : memref<1x1x10xf32, #tpu.memory_space<vmem>>, vector<1x1x10xf32>
    tpu.vector_store %arg16[%c0_112, %c0_113, %c0_114], %194 {strides = array<i32>} : memref<1x1x10xf32, #tpu.memory_space<vmem>>, vector<1x1x10xf32>,
    return
  }
  func.func @transform_0(%arg0: i32) -> (i32, i32, i32) {
    %c0_i32 = arith.constant 0 : i32
    %c0_i32_0 = arith.constant 0 : i32
    %c0_i32_1 = arith.constant 0 : i32
    return %arg0, %c0_i32, %c0_i32_0 : i32, i32, i32
  }
  func.func @transform_1(%arg0: i32) -> (i32, i32, i32) {
    %c0_i32 = arith.constant 0 : i32
    %c0_i32_0 = arith.constant 0 : i32
    %c0_i32_1 = arith.constant 0 : i32
    %c0_i32_2 = arith.constant 0 : i32
    return %c0_i32, %c0_i32_0, %c0_i32_1 : i32, i32, i32
  }
  func.func @transform_2(%arg0: i32) -> (i32, i32) {
    %c0_i32 = arith.constant 0 : i32
    %c0_i32_0 = arith.constant 0 : i32
    %c0_i32_1 = arith.constant 0 : i32
    return %c0_i32, %c0_i32_0 : i32, i32
  }
  func.func @transform_3(%arg0: i32) -> (i32, i32, i32) {
    %c0_i32 = arith.constant 0 : i32
    %c0_i32_0 = arith.constant 0 : i32
    %c0_i32_1 = arith.constant 0 : i32
    %c0_i32_2 = arith.constant 0 : i32
    return %c0_i32, %c0_i32_0, %c0_i32_1 : i32, i32, i32
  }
  func.func @transform_4(%arg0: i32) -> (i32, i32, i32) {
    %c0_i32 = arith.constant 0 : i32
    %c0_i32_0 = arith.constant 0 : i32
    %c0_i32_1 = arith.constant 0 : i32
    %c0_i32_2 = arith.constant 0 : i32
    return %c0_i32, %c0_i32_0, %c0_i32_1 : i32, i32, i32
  }
  func.func @transform_5(%arg0: i32) -> (i32, i32, i32) {
    %c0_i32 = arith.constant 0 : i32
    %c0_i32_0 = arith.constant 0 : i32
    %c0_i32_1 = arith.constant 0 : i32
    %c0_i32_2 = arith.constant 0 : i32
    return %c0_i32, %c0_i32_0, %c0_i32_1 : i32, i32, i32
  }
  func.func @transform_6(%arg0: i32) -> (i32, i32) {
    %c0_i32 = arith.constant 0 : i32
    %c0_i32_0 = arith.constant 0 : i32
    %c0_i32_1 = arith.constant 0 : i32
    return %c0_i32, %c0_i32_0 : i32, i32
  }
  func.func @transform_7(%arg0: i32) -> (i32, i32, i32) {
    %c0_i32 = arith.constant 0 : i32
    %c0_i32_0 = arith.constant 0 : i32
    %c0_i32_1 = arith.constant 0 : i32
    %c0_i32_2 = arith.constant 0 : i32
    return %c0_i32, %c0_i32_0, %c0_i32_1 : i32, i32, i32
  }
  func.func @transform_8(%arg0: i32) -> (i32, i32, i32) {
    %c0_i32 = arith.constant 0 : i32
    %c0_i32_0 = arith.constant 0 : i32
    %c0_i32_1 = arith.constant 0 : i32
    %c0_i32_2 = arith.constant 0 : i32
    return %c0_i32, %c0_i32_0, %c0_i32_1 : i32, i32, i32
  }
  func.func @transform_9(%arg0: i32) -> (i32, i32, i32) {
    %c0_i32 = arith.constant 0 : i32
    %c0_i32_0 = arith.constant 0 : i32
    %c0_i32_1 = arith.constant 0 : i32
    %c0_i32_2 = arith.constant 0 : i32
    return %c0_i32, %c0_i32_0, %c0_i32_1 : i32, i32, i32
  }
  func.func @transform_10(%arg0: i32) -> (i32, i32) {
    %c0_i32 = arith.constant 0 : i32
    %c0_i32_0 = arith.constant 0 : i32
    %c0_i32_1 = arith.constant 0 : i32
    return %c0_i32, %c0_i32_0 : i32, i32
  }
  func.func @transform_11(%arg0: i32) -> (i32, i32) {
    %c0_i32 = arith.constant 0 : i32
    %c0_i32_0 = arith.constant 0 : i32
    %c0_i32_1 = arith.constant 0 : i32
    return %c0_i32, %c0_i32_0 : i32, i32
  }
  func.func @transform_12(%arg0: i32) -> (i32, i32) {
    %c0_i32 = arith.constant 0 : i32
    %c0_i32_0 = arith.constant 0 : i32
    %c0_i32_1 = arith.constant 0 : i32
    return %c0_i32, %c0_i32_0 : i32, i32
  }
  func.func @transform_13(%arg0: i32) -> (i32, i32) {
    %c0_i32 = arith.constant 0 : i32
    %c0_i32_0 = arith.constant 0 : i32
    %c0_i32_1 = arith.constant 0 : i32
    return %c0_i32, %c0_i32_0 : i32, i32
  }
  func.func @transform_14(%arg0: i32) -> (i32, i32) {
    %c0_i32 = arith.constant 0 : i32
    %c0_i32_0 = arith.constant 0 : i32
    %c0_i32_1 = arith.constant 0 : i32
    return %c0_i32, %c0_i32_0 : i32, i32
  }
  func.func @transform_15(%arg0: i32) -> (i32, i32, i32) {
    %c0_i32 = arith.constant 0 : i32
    %c0_i32_0 = arith.constant 0 : i32
    %c0_i32_1 = arith.constant 0 : i32
    return %arg0, %c0_i32, %c0_i32_0 : i32, i32, i32
  }
}

</mosaic_0001>

<bundles_post_ra>
// kernel: net_forward.1
= control target key start
LH: loop header
LB: loop body
LE: loop exit
PB: predicated region body
PF: predicated region fallthrough
CT: control target
= control target key end

     0   :  { %s5021_s0 = inlined_call_operand.vmem [shape: f32[2,32,96], index: 0, kind: input, shape index: {}]   ;;  %s5022_s1 = inlined_call_operand.vmem [shape: f32[5,96,168], index: 1, kind: input, shape index: {}]   ;;  %s5023_s2 = inlined_call_operand.vmem [shape: f32[1,168], index: 2, kind: input, shape index: {}]   ;;  %s5024_s3 = inlined_call_operand.vmem [shape: f32[2,14,28], index: 3, kind: input, shape index: {}]   ;;  %s5025_s4 = inlined_call_operand.vmem [shape: f32[2,168,84], index: 4, kind: input, shape index: {}]   ;;  %s5026_s5 = inlined_call_operand.vmem [shape: f32[5,84,160], index: 5, kind: input, shape index: {}]   ;;  %s5027_s6 = inlined_call_operand.vmem [shape: f32[1,160], index: 6, kind: input, shape index: {}]   ;;  %s5028_s7 = inlined_call_operand.vmem [shape: f32[2,5,10], index: 7, kind: input, shape index: {}]   ;;  %s5029_s8 = inlined_call_operand.vmem [shape: f32[2,160,80], index: 8, kind: input, shape index: {}]   ;;  %s5030_s9 = inlined_call_operand.vmem [shape: f32[5,80,120], index: 9, kind: input, shape index: {}]   ;;  %s5031_s10 = inlined_call_operand.vmem [shape: f32[1,120], index: 10, kind: input, shape index: {}]   ;;  %s5032_s11 = inlined_call_operand.vmem [shape: f32[120,84], index: 11, kind: input, shape index: {}]   ;;  %s5033_s12 = inlined_call_operand.vmem [shape: f32[1,84], index: 12, kind: input, shape index: {}]   ;;  %s5034_s13 = inlined_call_operand.vmem [shape: f32[84,10], index: 13, kind: input, shape index: {}]   ;;  %s5035_s14 = inlined_call_operand.vmem [shape: f32[1,10], index: 14, kind: input, shape index: {}]   ;;  %s5036_s15 = inlined_call_operand.hbm [shape: f32[2,1,10], index: 15, kind: output, shape index: {}]  }
   0x1   :  { %5044 = sst [smem:[#allocation11_spill]] %s5036_s15 }
   0x2   :  { %20 = vsyncpa [#allocation3], 0 }
   0x3   :  { %22 = vsyncpa [#allocation3 + $0x1], 0  ;;  %s3456_s18 = smov 0   ;;  %s3458_s19 = smov 0  }
   0x4   :  { %s3460_s20 = smov 0   ;;  %s3462_s21 = smov 0  }
   0x5 LB: > { %5045 = sst [smem:[#allocation5_spill]] %s3358_s18  ;;  %s3477_s22 = sadd.s32 4294967295, %s3370_s21   ;;  %s3370_s21 = sphi %s3462_s21, %s5057_s21   ;;  %s3366_s20 = sphi %s3460_s20, %s5059_s20   ;;  %s3362_s19 = sphi %s3458_s19, %s5061_s19   ;;  %s3358_s18 = sphi %s3456_s18, %s5060_s18  }
   0x6   : > { %5046 = sst [smem:[#allocation6_spill]] %s3366_s20  ;;  %s2791_s23 = sadd.s32 4294967294, %s3370_s21  }
   0x7   : > { %5047 = sst [smem:[#allocation7_spill]] %s3370_s21  ;;  %s3481_s24 = sadd.s32 1, %s3370_s21  }
   0x8   : > { %5048 = sst [smem:[#allocation8_spill]] %s3481_s24  ;;  %s355_s25 = sadd.s32 1, %s3366_s20 }
   0x9   : > { %s352_s26 = ssub.s32 %s3370_s21, %s3481_s24  ;;  %p365_p0 = scmp.ne.s32.totalorder %s3366_s20, %s3362_s19 }
   0xa   : > { %p353_p1 = scmp.eq.s32.totalorder %s352_s26, 0  ;;  %p366_p2 = scmp.eq.s32.totalorder %s3477_s22, 1 }
   0xb   : > { %p371_p3 = scmp.ne.s32.totalorder %s3362_s19, %s3358_s18  ;;  %p372_p4 = scmp.eq.s32.totalorder %s2791_s23, 1 }
   0xc   : > { %s3492_s27 = scalar_select %p353_p1, %s3366_s20, %s355_s25  }
   0xd   : > { %p3494_p5 = por %p366_p2, %p365_p0  ;;  %p3498_p6 = por %p372_p4, %p371_p3 }
   0xe   : > { %5049 = sst [smem:[#allocation9_spill]] %s3492_s27  ;;  %p2794_p7 = scmp.ge.s32.totalorder %s3370_s21, 1 }
   0xf   : > { %s5051_s29 = scalar_select %p3498_p6, 1, 0 }
  0x10   : > { %p440_p8 = scmp.lt.s32.totalorder %s3370_s21, 3 }
  0x11   : > { %5052 = sst [smem:[#allocation10_spill]] %s5051_s29 }
  0x12   : > { %p441_p9 = pnand %p2794_p7, %p440_p8 }
  0x13   : > { %p487_p10 = scmp.lt.s32.totalorder (!%p441_p9), %s3477_s22, 1  ;;  %s3112_s20 = sshll.u32 (!%p441_p9), %s3477_s22, 4 }
  0x14   : > { %444 = sbr.rel (%p441_p9) target bundleno = 2041 (0x7f9), region = 80  ;;  %s5053_s27 = sld [smem:[#allocation11_spill]] (!%p441_p9) }
  0x15   : > { %s3375_s30 = smov (!%p441_p9), [#allocation2]  }
  0x16   : > { %s3314_s16 = sshll.u32 (!%p441_p9), %s3375_s30, 4  ;;  %s3315_s16 = int_to_ptr.vmem [resolvable:$false] %s3314_s16 }
  0x17   : > { %s3316_s21 = scalar_lea.vmem (!%p441_p9), %s3315_s16, 32 }
  0x19   : > { %v2818_v0 = vld [vmem:[%s5022_s1 + $0x168] sm:$0xff]  ;;  %v2820_v1 = vld [vmem:[%s5022_s1 + $0x178] sm:$0xff]  ;;  %v2817_v5 = vld [vmem:[%s5022_s1 + $0x160] sm:$0xff]  ;;  %v3372_v7 = vmov 0   ;;  %s3573_s17 = scalar_select %p487_p10, %s3477_s22, 1  ;;  %vm589_vm1 = vcmask 785408  }
  0x1a   : > { %v519_v2 = vld [vmem:[%s5022_s1 + $0xa8] sm:$0xff]  ;;  %v572_v3 = vpack.c.bf16 %v2820_v1, %v2818_v0  ;;  %v521_v4 = vld [vmem:[%s5022_s1 + $0xb8] sm:$0xff]  ;;  %v2819_v6 = vld [vmem:[%s5022_s1 + $0x170] sm:$0xff]  ;;  %628 = vmatprep.mubr.bf16.mxu0 %v3372_v7  ;;  %685 = vmatprep.mubr.bf16.mxu1 %v3372_v7  ;;  %vm573_vm0 = vsmask.f32 7424  ;;  %vm745_vm2 = vcmask 1046528   ;;  %s4980_s25 = scalar_lea.hbm %s5053_s27, %s3112_s20 }
  0x1b   : > { %v535_v8 = vpack.c.bf16 %v521_v4, %v519_v2  ;;  %v571_v9 = vpack.c.bf16 %v2819_v6, %v2817_v5  ;;  %v518_v10 = vld [vmem:[%s5022_s1 + $0xa0] sm:$0xff]  ;;  %v520_v11 = vld [vmem:[%s5022_s1 + $0xb0] sm:$0xff]  ;;  %v2814_v12 = vld [vmem:[%s5022_s1 + $0x148] sm:$0xff]  ;;  %s3115_s24 = sshll.u32 %s3573_s17, 5  ;;  %vm853_vm3 = vsmask.f32 6400 }
  0x1c   : > { %600 = vmatprep.subr.bf16.mxu0 %v572_v3  ;;  %v534_v13 = vpack.c.bf16 %v520_v11, %v518_v10  ;;  %v2816_v14 = vld [vmem:[%s5022_s1 + $0x158] sm:$0xff]  ;;  %v515_v15 = vld [vmem:[%s5022_s1 + $0x88] sm:$0xff]  ;;  %v2813_v19 = vld [vmem:[%s5022_s1 + $0x140] sm:$0xff]  ;;  %s491_s29 = scalar_lea.vmem %s5021_s0, %s3115_s24  ;;  %vm965_vm4 = vcmask 1045504   ;;  %vm1072_vm5 = vcmask 1043456   ;;  %vm1065_vm6 = vcmask 228352  }
  0x1d   : > { %v517_v16 = vld [vmem:[%s5022_s1 + $0x98] sm:$0xff]  ;;  %657 = vmatprep.subr.bf16.mxu1 %v535_v8  ;;  %601 = vmatpush1.bf16.msra.mxu0 %v571_v9  ;;  %v570_v17 = vpack.c.bf16 %v2816_v14, %v2814_v12  ;;  %v2815_v20 = vld [vmem:[%s5022_s1 + $0x150] sm:$0xff]  ;;  %v514_v21 = vld [vmem:[%s5022_s1 + $0x80] sm:$0xff]  ;;  %vm1530_vm7 = vcmask 1041408   ;;  %vm1267_vm8 = vcmask 326656   ;;  %vm1526_vm9 = vcmask 687104  }
  0x1e   : > { %v533_v18 = vpack.c.bf16 %v517_v16, %v515_v15  ;;  %658 = vmatpush1.bf16.msra.mxu1 %v534_v13  ;;  %v569_v22 = vpack.c.bf16 %v2815_v20, %v2813_v19  ;;  %v516_v23 = vld [vmem:[%s5022_s1 + $0x90] sm:$0xff]  ;;  %v2810_v24 = vld [vmem:[%s5022_s1 + $0x128] sm:$0xff]  ;;  %v2812_v25 = vld [vmem:[%s5022_s1 + $0x138] sm:$0xff]  ;;  %vm1930_vm10 = vcmask 80896   ;;  %vm2109_vm11 = vcmask 261120   ;;  %s485_s17 = sand.u32 1, %s3362_s19  }
  0x1f   : > { %602 = vmatprep.subr.bf16.mxu0 %v570_v17  ;;  %v532_v26 = vpack.c.bf16 %v516_v23, %v514_v21  ;;  %v568_v27 = vpack.c.bf16 %v2812_v25, %v2810_v24  ;;  %v511_v28 = vld [vmem:[%s5022_s1 + $0x68] sm:$0xff]  ;;  %v513_v29 = vld [vmem:[%s5022_s1 + $0x78] sm:$0xff]  ;;  %v2809_v30 = vld [vmem:[%s5022_s1 + $0x120] sm:$0xff]  ;;  %vm3374_vm12 = vmmov 0   ;;  %vm2310_vm13 = vcmask 654336   ;;  %s486_s18 = scalar_lea.vmem [#allocation2], %s485_s17 }
  0x20   : > { %659 = vmatprep.subr.bf16.mxu1 %v533_v18  ;;  %v531_v31 = vpack.c.bf16 %v513_v29, %v511_v28  ;;  %v2811_v32 = vld [vmem:[%s5022_s1 + $0x130] sm:$0xff]  ;;  %v510_v33 = vld [vmem:[%s5022_s1 + $0x60] sm:$0xff]  ;;  %v2806_v36 = vld [vmem:[%s5022_s1 + $0x108] sm:$0xff]  ;;  %vm2608_vm14 = vcmask 982016   ;;  %s2736_s24 = sshll.u32 %s486_s18, 4  ;;  %vm2721_vm15 = vcmask 73728   ;;  %s4982_s24 = int_to_ptr.vmem [resolvable:$true] %s2736_s24 }
  0x21   : > { %v512_v34 = vld [vmem:[%s5022_s1 + $0x70] sm:$0xff]  ;;  %603 = vmatpush1.bf16.msra.mxu0 %v569_v22  ;;  %v567_v35 = vpack.c.bf16 %v2811_v32, %v2809_v30  ;;  %v2808_v37 = vld [vmem:[%s5022_s1 + $0x118] sm:$0xff]  ;;  %v507_v38 = vld [vmem:[%s5022_s1 + $0x48] sm:$0xff]  ;;  %s2724_s26 = scalar_lea.sflag [#allocation3], %s485_s17  ;;  %s3310_s22 = scalar_lea.vmem %s4982_s24, 16 }
  0x22   : > { %660 = vmatpush1.bf16.msra.mxu1 %v532_v26  ;;  %604 = vmatprep.subr.bf16.mxu0 %v568_v27  ;;  %v530_v39 = vpack.c.bf16 %v512_v34, %v510_v33  ;;  %v566_v40 = vpack.c.bf16 %v2808_v37, %v2806_v36  ;;  %v509_v41 = vld [vmem:[%s5022_s1 + $0x58] sm:$0xff]  ;;  %v2805_v42 = vld [vmem:[%s5022_s1 + $0x100] sm:$0xff]  ;;  %v2807_v43 = vld [vmem:[%s5022_s1 + $0x110] sm:$0xff]  ;;  %p3311_p11 = scmp.ne.s32.totalorder %s4982_s24, %s3310_s22  ;;  %p3317_p0 = scmp.lt.s32.totalorder %s4982_s24, %s3315_s16 }
  0x23   : > { %661 = vmatprep.subr.bf16.mxu1 %v531_v31  ;;  %v529_v44 = vpack.c.bf16 %v509_v41, %v507_v38  ;;  %v506_v45 = vld [vmem:[%s5022_s1 + $0x40] sm:$0xff]  ;;  %v508_v46 = vld [vmem:[%s5022_s1 + $0x50] sm:$0xff]  ;;  %v2802_v47 = vld [vmem:[%s5022_s1 + $0xe8] sm:$0xff]  ;;  %v565_v51 = vpack.c.bf16 %v2807_v43, %v2805_v42  ;;  %p3318_p1 = scmp.lt.s32.totalorder %s3316_s21, %s3310_s22 }
  0x24   : > { %v2804_v48 = vld [vmem:[%s5022_s1 + $0xf8] sm:$0xff]  ;;  %v503_v49 = vld [vmem:[%s5022_s1 + $0x28] sm:$0xff]  ;;  %v528_v52 = vpack.c.bf16 %v508_v46, %v506_v45  ;;  %v2801_v54 = vld [vmem:[%s5022_s1 + $0xe0] sm:$0xff]  ;;  %p3312_p12 = pnand %p3311_p11, %p3494_p5 }
  0x25   : > { %v505_v50 = vld [vmem:[%s5022_s1 + $0x38] sm:$0xff]  ;;  %605 = vmatpush1.bf16.msra.mxu0 %v567_v35  ;;  %v564_v53 = vpack.c.bf16 %v2804_v48, %v2802_v47  ;;  %v2803_v55 = vld [vmem:[%s5022_s1 + $0xf0] sm:$0xff]  ;;  %v502_v56 = vld [vmem:[%s5022_s1 + $0x20] sm:$0xff]  ;;  %p3319_p2 = por %p3318_p1, %p3317_p0 }
  0x26   : > { %662 = vmatpush1.bf16.msra.mxu1 %v530_v39  ;;  %606 = vmatprep.subr.bf16.mxu0 %v566_v40  ;;  %v527_v57 = vpack.c.bf16 %v505_v50, %v503_v49  ;;  %v504_v58 = vld [vmem:[%s5022_s1 + $0x30] sm:$0xff]  ;;  %v2798_v59 = vld [vmem:[%s5022_s1 + $0xc8] sm:$0xff]  ;;  %v2800_v60 = vld [vmem:[%s5022_s1 + $0xd8] sm:$0xff]  ;;  %v563_v0 = vpack.c.bf16 %v2803_v55, %v2801_v54  ;;  %p3313_p13 = pneg %p3312_p12 }
  0x27   : > { %663 = vmatprep.subr.bf16.mxu1 %v529_v44  ;;  %v499_v61 = vld [vmem:[%s5022_s1 + $0x8] sm:$0xff]  ;;  %v501_v62 = vld [vmem:[%s5022_s1 + $0x18] sm:$0xff]  ;;  %v2797_v63 = vld [vmem:[%s5022_s1 + $0xc0] sm:$0xff]  ;;  %v526_v4 = vpack.c.bf16 %v504_v58, %v502_v56  ;;  %v562_v5 = vpack.c.bf16 %v2800_v60, %v2798_v59 }
  0x28   : > { %v493_v1 = vld [vmem:[%s491_s29] sm:$0xff]  ;;  %v494_v2 = vld [vmem:[%s491_s29 + $0x8] sm:$0xff]  ;;  %v495_v3 = vld [vmem:[%s491_s29 + $0x10] sm:$0xff]  ;;  %v525_v11 = vpack.c.bf16 %v501_v62, %v499_v61  ;;  %p3320_p3 = pnand %p3319_p2, %p3313_p13 }
  0x29   : > { %607 = vmatpush1.bf16.msra.mxu0 %v565_v51  ;;  %v2799_v6 = vld [vmem:[%s5022_s1 + $0xd0] sm:$0xff]  ;;  %v498_v8 = vld [vmem:[%s5022_s1] sm:$0xff]  ;;  %v496_v9 = vld [vmem:[%s491_s29 + $0x18] sm:$0xff]  ;;  %v3657_v10 = vpack.c.bf16 %v494_v2, %v493_v1 }
  0x2a   : > { %664 = vmatpush1.bf16.msra.mxu1 %v528_v52  ;;  %608 = vmatprep.subr.bf16.mxu0 %v564_v53  ;;  %v500_v12 = vld [vmem:[%s5022_s1 + $0x10] sm:$0xff]  ;;  %v3662_v13 = vpack.c.bf16 %v496_v9, %v495_v3  ;;  %v2846_v14 = vld [vmem:[%s5022_s1 + $0x228] sm:$0xff]  ;;  %v2848_v15 = vld [vmem:[%s5022_s1 + $0x238] sm:$0xff]  ;;  %v561_v20 = vpack.c.bf16 %v2799_v6, %v2797_v63 }
  0x2b   : > { %665 = vmatprep.subr.bf16.mxu1 %v527_v57  ;;  %v575_v16 = vshrl.u32 %v3657_v10, 16  ;;  %v577_v17 = vshll.u32 %v3657_v10, 16  ;;  %v2872_v18 = vld [vmem:[%s5022_s1 + $0x2e8] sm:$0xff]  ;;  %v2874_v19 = vld [vmem:[%s5022_s1 + $0x2f8] sm:$0xff]  ;;  %v524_v22 = vpack.c.bf16 %v500_v12, %v498_v8  ;;  %v742_v24 = vpack.c.bf16 %v2848_v15, %v2846_v14  ;;  %v2845_v25 = vld [vmem:[%s5022_s1 + $0x220] sm:$0xff] }
  0x2c   : > { %v582_v21 = vshll.u32 %v3662_v13, 16  ;;  %v2847_v26 = vld [vmem:[%s5022_s1 + $0x230] sm:$0xff]  ;;  %v2871_v27 = vld [vmem:[%s5022_s1 + $0x2e0] sm:$0xff]  ;;  %v852_v29 = vpack.c.bf16 %v2874_v19, %v2872_v18  ;;  %v2842_v31 = vld [vmem:[%s5022_s1 + $0x208] sm:$0xff]  ;;  %v586_v49 = vshrl.u32 %v3662_v13, 16 }
  0x2d   : > { %609 = vmatpush1.bf16.msra.mxu0 %v563_v0  ;;  %v579_v23 = vrot.slane %v577_v17, 1  ;;  %v2873_v30 = vld [vmem:[%s5022_s1 + $0x2f0] sm:$0xff]  ;;  %v2844_v32 = vld [vmem:[%s5022_s1 + $0x218] sm:$0xff]  ;;  %v2868_v34 = vld [vmem:[%s5022_s1 + $0x2c8] sm:$0xff]  ;;  %v741_v36 = vpack.c.bf16 %v2847_v26, %v2845_v25 }
  0x2e   : > { %666 = vmatpush1.bf16.msra.mxu1 %v526_v4  ;;  %610 = vmatprep.subr.bf16.mxu0 %v562_v5  ;;  %v584_v28 = vrot.slane %v582_v21, 1  ;;  %v2870_v35 = vld [vmem:[%s5022_s1 + $0x2d8] sm:$0xff]  ;;  %v851_v38 = vpack.c.bf16 %v2873_v30, %v2871_v27  ;;  %v740_v39 = vpack.c.bf16 %v2844_v32, %v2842_v31  ;;  %v2841_v40 = vld [vmem:[%s5022_s1 + $0x200] sm:$0xff]  ;;  %v2843_v41 = vld [vmem:[%s5022_s1 + $0x210] sm:$0xff]  ;;  %v855_v30 = vrot.slane %v577_v17, 2 }
  0x2f   : > { %667 = vmatprep.subr.bf16.mxu1 %v525_v11  ;;  %v580_v33 = vor.u32 %v579_v23, %v575_v16  ;;  %v2867_v42 = vld [vmem:[%s5022_s1 + $0x2c0] sm:$0xff]  ;;  %v850_v43 = vpack.c.bf16 %v2870_v35, %v2868_v34  ;;  %v2869_v44 = vld [vmem:[%s5022_s1 + $0x2d0] sm:$0xff]  ;;  %v2838_v45 = vld [vmem:[%s5022_s1 + $0x1e8] sm:$0xff]  ;;  %v739_v50 = vpack.c.bf16 %v2843_v41, %v2841_v40  ;;  %v858_v32 = vrot.slane %v582_v21, 2 }
  0x30   : > { %v2840_v46 = vld [vmem:[%s5022_s1 + $0x1f8] sm:$0xff]  ;;  %v2864_v47 = vld [vmem:[%s5022_s1 + $0x2a8] sm:$0xff]  ;;  %v849_v51 = vpack.c.bf16 %v2869_v44, %v2867_v42  ;;  %v2837_v53 = vld [vmem:[%s5022_s1 + $0x1e0] sm:$0xff]  ;;  %v588_v60 = vor.u32 %v586_v49, %v584_v28  ;;  %v746_v41 = vrot.slane %v3657_v10, 1  ;;  %v747_v42 = vrot.slane %v3662_v13, 1 }
  0x31   : > { %611 = vmatpush1.bf16.msra.mxu0 %v561_v20  ;;  %v585_v37 = vsel %vm573_vm0, %v580_v33, %v584_v28  ;;  %v2866_v48 = vld [vmem:[%s5022_s1 + $0x2b8] sm:$0xff]  ;;  %v738_v52 = vpack.c.bf16 %v2840_v46, %v2838_v45  ;;  %v2839_v54 = vld [vmem:[%s5022_s1 + $0x1f0] sm:$0xff]  ;;  %v2863_v55 = vld [vmem:[%s5022_s1 + $0x2a0] sm:$0xff]  ;;  %v857_v33 = vrot.slane %v586_v49, 1 }
  0x32   : > { %668 = vmatpush1.bf16.msra.mxu1 %v524_v22  ;;  %759 = vmatprep.subr.bf16.mxu0 %v742_v24  ;;  %v848_v56 = vpack.c.bf16 %v2866_v48, %v2864_v47  ;;  %v2865_v57 = vld [vmem:[%s5022_s1 + $0x2b0] sm:$0xff]  ;;  %v2834_v58 = vld [vmem:[%s5022_s1 + $0x1c8] sm:$0xff]  ;;  %v2836_v59 = vld [vmem:[%s5022_s1 + $0x1d8] sm:$0xff]  ;;  %v737_v63 = vpack.c.bf16 %v2839_v54, %v2837_v53 }
  0x33   : > { %871 = vmatprep.subr.bf16.mxu1 %v852_v29  ;;  %v2860_v61 = vld [vmem:[%s5022_s1 + $0x288] sm:$0xff]  ;;  %v2862_v62 = vld [vmem:[%s5022_s1 + $0x298] sm:$0xff]  ;;  %v847_v0 = vpack.c.bf16 %v2865_v57, %v2863_v55  ;;  %v736_v1 = vpack.c.bf16 %v2836_v59, %v2834_v58  ;;  %v2833_v2 = vld [vmem:[%s5022_s1 + $0x1c0] sm:$0xff]  ;;  %v854_v29 = vrot.slane %v575_v16, 1  ;;  %v859_v48 = vor.u32 %v858_v32, %v857_v33 }
  0x34   : > { %2821 = vmatmul.mubr.msk.bf16.vlgmr.msra.gmra.mxu0 %vm589_vm1, %v585_v37  ;;  %v2835_v3 = vld [vmem:[%s5022_s1 + $0x1d0] sm:$0xff]  ;;  %v2859_v4 = vld [vmem:[%s5022_s1 + $0x280] sm:$0xff]  ;;  %v846_v5 = vpack.c.bf16 %v2862_v62, %v2860_v61  ;;  %v2830_v8 = vld [vmem:[%s5022_s1 + $0x1a8] sm:$0xff] }
  0x35   : > { %2823 = vmatmul.mubr.msk.bf16.vlgmr.msra.gmra.mxu1 %vm589_vm1, %v3657_v10  ;;  %760 = vmatpush1.bf16.msra.mxu0 %v741_v36  ;;  %v2861_v6 = vld [vmem:[%s5022_s1 + $0x290] sm:$0xff]  ;;  %v2832_v9 = vld [vmem:[%s5022_s1 + $0x1b8] sm:$0xff]  ;;  %v2856_v11 = vld [vmem:[%s5022_s1 + $0x268] sm:$0xff]  ;;  %v735_v14 = vpack.c.bf16 %v2835_v3, %v2833_v2 }
  0x36   : > { %872 = vmatpush1.bf16.msra.mxu1 %v851_v38  ;;  %761 = vmatprep.subr.bf16.mxu0 %v740_v39  ;;  %v2858_v12 = vld [vmem:[%s5022_s1 + $0x278] sm:$0xff]  ;;  %v845_v15 = vpack.c.bf16 %v2861_v6, %v2859_v4  ;;  %v734_v18 = vpack.c.bf16 %v2832_v9, %v2830_v8  ;;  %v2829_v19 = vld [vmem:[%s5022_s1 + $0x1a0] sm:$0xff]  ;;  %v2831_v20 = vld [vmem:[%s5022_s1 + $0x1b0] sm:$0xff] }
  0x37   : > { %873 = vmatprep.subr.bf16.mxu1 %v850_v43  ;;  %638 = vmatprep.mubr.bf16.mxu0 %v3372_v7  ;;  %v2855_v22 = vld [vmem:[%s5022_s1 + $0x260] sm:$0xff]  ;;  %v844_v23 = vpack.c.bf16 %v2858_v12, %v2856_v11  ;;  %v2857_v24 = vld [vmem:[%s5022_s1 + $0x270] sm:$0xff]  ;;  %v2826_v25 = vld [vmem:[%s5022_s1 + $0x188] sm:$0xff]  ;;  %v733_v31 = vpack.c.bf16 %v2831_v20, %v2829_v19  ;;  %v856_v43 = vor.u32 %v855_v30, %v854_v29 }
  0x38   : > { %695 = vmatprep.mubr.bf16.mxu1 %v3372_v7  ;;  %v2828_v26 = vld [vmem:[%s5022_s1 + $0x198] sm:$0xff]  ;;  %v2852_v27 = vld [vmem:[%s5022_s1 + $0x248] sm:$0xff]  ;;  %v843_v34 = vpack.c.bf16 %v2857_v24, %v2855_v22  ;;  %v2825_v36 = vld [vmem:[%s5022_s1 + $0x180] sm:$0xff]  ;;  %v966_v24 = vrot.slane %v3657_v10, 2 }
  0x39   : > { %762 = vmatpush1.bf16.msra.mxu0 %v739_v50  ;;  %v2854_v28 = vld [vmem:[%s5022_s1 + $0x258] sm:$0xff]  ;;  %v732_v35 = vpack.c.bf16 %v2828_v26, %v2826_v25  ;;  %v2827_v16 = vld [vmem:[%s5022_s1 + $0x190] sm:$0xff]  ;;  %v2851_v17 = vld [vmem:[%s5022_s1 + $0x240] sm:$0xff]  ;;  %v860_v53 = vsel %vm853_vm3, %v856_v43, %v859_v48  ;;  %v967_v25 = vrot.slane %v3662_v13, 2 }
  0x3a   : > { %874 = vmatpush1.bf16.msra.mxu1 %v849_v51  ;;  %763 = vmatprep.subr.bf16.mxu0 %v738_v52  ;;  %v842_v37 = vpack.c.bf16 %v2854_v28, %v2852_v27  ;;  %v2853_v21 = vld [vmem:[%s5022_s1 + $0x250] sm:$0xff]  ;;  %v2898_v38 = vld [vmem:[%s5022_s1 + $0x3a8] sm:$0xff]  ;;  %v2900_v39 = vld [vmem:[%s5022_s1 + $0x3b8] sm:$0xff]  ;;  %v731_v40 = vpack.c.bf16 %v2827_v16, %v2825_v36  ;;  %v748_v51 = vsel %vm745_vm2, %v746_v41, %v747_v42  ;;  %v3373_v27 = vmov 0.0  }
  0x3b   : > { %875 = vmatprep.subr.bf16.mxu1 %v848_v56  ;;  %v841_v44 = vpack.c.bf16 %v2853_v21, %v2851_v17  ;;  %v964_v45 = vpack.c.bf16 %v2900_v39, %v2898_v38  ;;  %v2897_v46 = vld [vmem:[%s5022_s1 + $0x3a0] sm:$0xff]  ;;  %v2899_v47 = vld [vmem:[%s5022_s1 + $0x3b0] sm:$0xff]  ;;  %v2894_v49 = vld [vmem:[%s5022_s1 + $0x388] sm:$0xff]  ;;  %v968_v26 = vsel %vm965_vm4, %v966_v24, %v967_v25 }
  0x3c   : > { %2822 = vmatmul.mubr.msk.bf16.gmra.mxu0 %vm589_vm1, %v588_v60  ;;  %v2896_v50 = vld [vmem:[%s5022_s1 + $0x398] sm:$0xff]  ;;  %v963_v52 = vpack.c.bf16 %v2899_v47, %v2897_v46  ;;  %v2893_v55 = vld [vmem:[%s5022_s1 + $0x380] sm:$0xff]  ;;  %v2895_v56 = vld [vmem:[%s5022_s1 + $0x390] sm:$0xff] }
  0x3d   : > { %764 = vmatpush1.bf16.msra.mxu0 %v737_v63  ;;  %2824 = vmatmul.mubr.msk.bf16.gmra.mxu1 %vm589_vm1, %v3662_v13  ;;  %v962_v54 = vpack.c.bf16 %v2896_v50, %v2894_v49  ;;  %v2890_v57 = vld [vmem:[%s5022_s1 + $0x368] sm:$0xff]  ;;  %v2892_v58 = vld [vmem:[%s5022_s1 + $0x378] sm:$0xff]  ;;  %v961_v59 = vpack.c.bf16 %v2895_v56, %v2893_v55  ;;  %v2889_v61 = vld [vmem:[%s5022_s1 + $0x360] sm:$0xff] }
  0x3e   : > { %876 = vmatpush1.bf16.msra.mxu1 %v847_v0  ;;  %765 = vmatprep.subr.bf16.mxu0 %v736_v1  ;;  %v960_v60 = vpack.c.bf16 %v2892_v58, %v2890_v57  ;;  %v2891_v62 = vld [vmem:[%s5022_s1 + $0x370] sm:$0xff]  ;;  %v2886_v63 = vld [vmem:[%s5022_s1 + $0x348] sm:$0xff]  ;;  %v2888_v0 = vld [vmem:[%s5022_s1 + $0x358] sm:$0xff] }
  0x3f   : > { %877 = vmatprep.subr.bf16.mxu1 %v846_v5  ;;  %787 = vmatprep.mubr.bf16.mxu0 %v3372_v7  ;;  %v959_v1 = vpack.c.bf16 %v2891_v62, %v2889_v61  ;;  %v958_v2 = vpack.c.bf16 %v2888_v0, %v2886_v63  ;;  %v2885_v3 = vld [vmem:[%s5022_s1 + $0x340] sm:$0xff]  ;;  %v2887_v4 = vld [vmem:[%s5022_s1 + $0x350] sm:$0xff]  ;;  %v2882_v5 = vld [vmem:[%s5022_s1 + $0x328] sm:$0xff] }
  0x40   : > { %899 = vmatprep.mubr.bf16.mxu1 %v3372_v7  ;;  %v2884_v6 = vld [vmem:[%s5022_s1 + $0x338] sm:$0xff]  ;;  %v957_v8 = vpack.c.bf16 %v2887_v4, %v2885_v3  ;;  %v2881_v11 = vld [vmem:[%s5022_s1 + $0x320] sm:$0xff]  ;;  %v2883_v12 = vld [vmem:[%s5022_s1 + $0x330] sm:$0xff]  ;;  %v1037_v4 = vlaneseq }
  0x41   : > { %766 = vmatpush1.bf16.msra.mxu0 %v735_v14  ;;  %v956_v9 = vpack.c.bf16 %v2884_v6, %v2882_v5  ;;  %v2878_v14 = vld [vmem:[%s5022_s1 + $0x308] sm:$0xff]  ;;  %v2877_v20 = vld [vmem:[%s5022_s1 + $0x300] sm:$0xff]  ;;  %v2879_v22 = vld [vmem:[%s5022_s1 + $0x310] sm:$0xff] }
  0x42   : > { %878 = vmatpush1.bf16.msra.mxu1 %v845_v15  ;;  %767 = vmatprep.subr.bf16.mxu0 %v734_v18  ;;  %v2880_v15 = vld [vmem:[%s5022_s1 + $0x318] sm:$0xff]  ;;  %v955_v18 = vpack.c.bf16 %v2883_v12, %v2881_v11  ;;  %v1260_v13 = vld [vmem:[%s5025_s4 + $0x70] sm:$0xff]  ;;  %v1259_v28 = vld [vmem:[%s5025_s4 + $0x68] sm:$0xff] }
  0x43   : > { %879 = vmatprep.subr.bf16.mxu1 %v844_v23  ;;  %v954_v19 = vpack.c.bf16 %v2880_v15, %v2878_v14  ;;  %v953_v23 = vpack.c.bf16 %v2879_v22, %v2877_v20  ;;  %v1261_v10 = vld [vmem:[%s5025_s4 + $0x78] sm:$0xff]  ;;  %v1258_v29 = vld [vmem:[%s5025_s4 + $0x60] sm:$0xff]  ;;  %v1255_v32 = vld [vmem:[%s5025_s4 + $0x48] sm:$0xff]  ;;  %v3978_v14 = vshrl.u32 %v1037_v4, 7 }
  0x44   : > { %v1257_v30 = vld [vmem:[%s5025_s4 + $0x58] sm:$0xff]  ;;  %v1254_v33 = vld [vmem:[%s5025_s4 + $0x40] sm:$0xff]  ;;  %v1251_v36 = vld [vmem:[%s5025_s4 + $0x28] sm:$0xff] }
  0x45   : > { %768 = vmatpush1.bf16.msra.mxu0 %v733_v31  ;;  %v1256_v31 = vld [vmem:[%s5025_s4 + $0x50] sm:$0xff]  ;;  %v1250_v16 = vld [vmem:[%s5025_s4 + $0x20] sm:$0xff]  ;;  %v1249_v17 = vld [vmem:[%s5025_s4 + $0x18] sm:$0xff] }
  0x46   : > { %880 = vmatpush1.bf16.msra.mxu1 %v843_v34  ;;  %769 = vmatprep.subr.bf16.mxu0 %v732_v35  ;;  %v1253_v34 = vld [vmem:[%s5025_s4 + $0x38] sm:$0xff]  ;;  %v1252_v35 = vld [vmem:[%s5025_s4 + $0x30] sm:$0xff] }
  0x47   : > { %881 = vmatprep.subr.bf16.mxu1 %v842_v37  ;;  %v1248_v37 = vld [vmem:[%s5025_s4 + $0x10] sm:$0xff] }
  0x49   : > { %770 = vmatpush1.bf16.msra.mxu0 %v731_v40 }
  0x4a   : > { %882 = vmatpush1.bf16.msra.mxu1 %v841_v44  ;;  %979 = vmatprep.subr.bf16.mxu0 %v964_v45 }
  0x4c   : > { %2849 = vmatmul.mubr.msk.bf16.vlgmr.msra.gmra.mxu0 %vm589_vm1, %v748_v51 }
  0x4d   : > { %980 = vmatpush1.bf16.msra.mxu0 %v963_v52  ;;  %2875 = vmatmul.mubr.msk.bf16.vlgmr.msra.gmra.mxu1 %vm589_vm1, %v860_v53 }
  0x4e   : > { %981 = vmatprep.subr.bf16.mxu0 %v962_v54  ;;  %797 = vmatprep.mubr.bf16.mxu0 %v3372_v7 }
  0x4f   : > { %909 = vmatprep.mubr.bf16.mxu1 %v3372_v7 }
  0x51   : > { %982 = vmatpush1.bf16.msra.mxu0 %v961_v59 }
  0x52   : > { %983 = vmatprep.subr.bf16.mxu0 %v960_v60 }
  0x54   : > { %2850 = vmatmul.mubr.msk.bf16.gmra.mxu0 %vm589_vm1, %v747_v42 }
  0x55   : > { %984 = vmatpush1.bf16.msra.mxu0 %v959_v1  ;;  %2876 = vmatmul.mubr.msk.bf16.gmra.mxu1 %vm589_vm1, %v859_v48 }
  0x56   : > { %985 = vmatprep.subr.bf16.mxu0 %v958_v2  ;;  %1007 = vmatprep.mubr.bf16.mxu0 %v3372_v7 }
  0x57   : > { %1143 = vmatprep.mubr.f32.mxu1 %v3373_v27 }
  0x59   : > { %986 = vmatpush1.bf16.msra.mxu0 %v957_v8 }
  0x5a   : > { %987 = vmatprep.subr.bf16.mxu0 %v956_v9 }
  0x5d   : > { %988 = vmatpush1.bf16.msra.mxu0 %v955_v18 }
  0x5e   : > { %989 = vmatprep.subr.bf16.mxu0 %v954_v19 }
  0x61   : > { %990 = vmatpush1.bf16.msra.mxu0 %v953_v23 }
  0x62   : > { %1274 = vmatprep.subr.mxu0 %v3373_v27 }
  0x64   : > { %2901 = vmatmul.mubr.msk.bf16.vlgmr.msra.gmra.mxu0 %vm589_vm1, %v968_v26 }
  0x65   : > { %1017 = vmatprep.mubr.bf16.mxu0 %v3372_v7  ;;  %1275 = vmatpush1.msra.mxu0 %v1261_v10 }
  0x66   : > { %1276 = vmatprep.subr.mxu0 %v3373_v27 }
  0x67   : > { %1277 = vmatpush1.msra.mxu0 %v1260_v13 }
  0x68   : > { %1278 = vmatprep.subr.mxu0 %v3373_v27 }
  0x69   : > { %1279 = vmatpush1.msra.mxu0 %v1259_v28 }
  0x6a   : > { %1280 = vmatprep.subr.mxu0 %v3373_v27 }
  0x6b   : > { %1281 = vmatpush1.msra.mxu0 %v1258_v29 }
  0x6c   : > { %2902 = vmatmul.mubr.msk.bf16.gmra.mxu0 %vm589_vm1, %v967_v25  ;;  %1282 = vmatprep.subr.mxu0 %v3373_v27 }
  0x6d   : > { %1283 = vmatpush1.msra.mxu0 %v1257_v30 }
  0x6e   : > { %1284 = vmatprep.subr.mxu0 %v3373_v27 }
  0x6f   : > { %1285 = vmatpush1.msra.mxu0 %v1256_v31  ;;  %v1039_v31 = vsub.s32 0, %v3978_v14 }
  0x70   : > { %1286 = vmatprep.subr.mxu0 %v3373_v27 }
  0x71   : > { %1287 = vmatpush1.msra.mxu0 %v1255_v32 }
  0x72   : > { %1288 = vmatprep.subr.mxu0 %v3373_v27 }
  0x73   : > { %1289 = vmatpush1.msra.mxu0 %v1254_v33 }
  0x74   : > { %1290 = vmatprep.subr.mxu0 %v3373_v27 }
  0x75   : > { %1291 = vmatpush1.msra.mxu0 %v1253_v34 }
  0x76   : > { %1292 = vmatprep.subr.mxu0 %v3373_v27 }
  0x77   : > { %1293 = vmatpush1.msra.mxu0 %v1252_v35 }
  0x78   : > { %1294 = vmatprep.subr.mxu0 %v3373_v27 }
  0x79   : > { %1295 = vmatpush1.msra.mxu0 %v1251_v36  ;;  %v497_v36 = vld [vmem:[%s5023_s2] sm:$0x3] }
  0x7a   : > { %1296 = vmatprep.subr.mxu0 %v3373_v27 }
  0x7b   : > { %1297 = vmatpush1.msra.mxu0 %v1250_v16  ;;  %v1043_v16 = vsub.s32 1, %v3978_v14  ;;  %v3039_v14 = vld [vmem:[%s5028_s7 + $0x8] sm:$0x1f] }
  0x7c   : > { %1298 = vmatprep.subr.mxu0 %v3373_v27 }
  0x7d   : > { %1299 = vmatpush1.msra.mxu0 %v1249_v17 }
  0x7e   : > { %1300 = vmatprep.subr.mxu0 %v3373_v27 }
  0x7f   : > { %1301 = vmatpush1.msra.mxu0 %v1248_v37 }
  0x80   : > { %1302 = vmatprep.subr.mxu0 %v3373_v27 }
  0xf4   : > { %v630_v21 = vpop.f32.mrf.mxu0 }
  0xf5   : > { %v687_v38 = vpop.f32.mrf.mxu1 }
  0xf6   : > { %v632_v39 = vpop.f32.mrf.mxu0  ;;  %v688_v28 = vadd.f32 %v687_v38, %v630_v21 }
  0xf7   : > { %v689_v41 = vpop.f32.mrf.mxu1 }
  0xf8   : > { %v634_v40 = vpop.f32.mrf.mxu0  ;;  %v690_v26 = vadd.f32 %v689_v41, %v632_v39 }
  0xf9   : > { %v691_v43 = vpop.f32.mrf.mxu1 }
  0xfa   : > { %v636_v42 = vpop.f32.mrf.mxu0  ;;  %v692_v23 = vadd.f32 %v691_v43, %v634_v40  ;;  %v1040_v43 = vrot.slane %v497_v36, %v1039_v31 }
  0xfb   : > { %v693_v45 = vpop.f32.mrf.mxu1 }
  0xfc   : > { %v640_v44 = vpop.f32.mrf.mxu0  ;;  %v694_v18 = vadd.f32 %v693_v45, %v636_v42 }
  0xfd   : > { %v697_v47 = vpop.f32.mrf.mxu1 }
  0xfe   : > { %v642_v46 = vpop.f32.mrf.mxu0  ;;  %v698_v11 = vadd.f32 %v697_v47, %v640_v44  ;;  %v1044_v47 = vrot.slane %v497_v36, %v1043_v16  ;;  %v2935_v36 = vld [vmem:[%s5025_s4 + $0x148] sm:$0xff] }
  0xff   : > { %v699_v49 = vpop.f32.mrf.mxu1 }
 0x100   : > { %v644_v48 = vpop.f32.mrf.mxu0  ;;  %v700_v8 = vadd.f32 %v699_v49, %v642_v46 }
 0x101   : > { %v701_v51 = vpop.f32.mrf.mxu1 }
 0x102   : > { %v646_v50 = vpop.f32.mrf.mxu0  ;;  %v702_v9 = vadd.f32 %v701_v51, %v644_v48 }
 0x103   : > { %v703_v54 = vpop.f32.mrf.mxu1 }
 0x104   : > { %v704_v19 = vadd.f32 %v703_v54, %v646_v50 }
 0x10c   : > { %v789_v52 = vpop.f32.mrf.mxu0 }
 0x10d   : > { %v901_v56 = vpop.f32.mrf.mxu1  ;;  %v808_v17 = vadd.f32 %v789_v52, %v688_v28  ;;  %v2918_v28 = vld [vmem:[%s5025_s4 + $0xc0] sm:$0xff] }
 0x10e   : > { %v791_v53 = vpop.f32.mrf.mxu0 }
 0x10f   : > { %v903_v58 = vpop.f32.mrf.mxu1  ;;  %v809_v33 = vadd.f32 %v791_v53, %v690_v26  ;;  %v920_v50 = vadd.f32 %v901_v56, %v808_v17  ;;  %v2921_v26 = vld [vmem:[%s5025_s4 + $0xd8] sm:$0xff] }
 0x110   : > { %v793_v55 = vpop.f32.mrf.mxu0  ;;  %v1265_v17 = vld [vmem:[%s5025_s4 + $0x98] sm:$0xff] }
 0x111   : > { %v905_v60 = vpop.f32.mrf.mxu1  ;;  %v810_v29 = vadd.f32 %v793_v55, %v692_v23  ;;  %v921_v46 = vadd.f32 %v903_v58, %v809_v33  ;;  %v2924_v23 = vld [vmem:[%s5025_s4 + $0xf0] sm:$0xff]  ;;  %v1246_v33 = vld [vmem:[%s5025_s4] sm:$0xff] }
 0x112   : > { %v795_v57 = vpop.f32.mrf.mxu0 }
 0x113   : > { %v907_v62 = vpop.f32.mrf.mxu1  ;;  %v811_v10 = vadd.f32 %v795_v57, %v694_v18  ;;  %v922_v42 = vadd.f32 %v905_v60, %v810_v29  ;;  %v2928_v18 = vld [vmem:[%s5025_s4 + $0x110] sm:$0xff]  ;;  %v2917_v29 = vld [vmem:[%s5025_s4 + $0xb8] sm:$0xff] }
 0x114   : > { %v799_v59 = vpop.f32.mrf.mxu0 }
 0x115   : > { %v911_v0 = vpop.f32.mrf.mxu1  ;;  %v812_v24 = vadd.f32 %v799_v59, %v698_v11  ;;  %v923_v40 = vadd.f32 %v907_v62, %v811_v10  ;;  %v2930_v11 = vld [vmem:[%s5025_s4 + $0x120] sm:$0xff]  ;;  %v2920_v10 = vld [vmem:[%s5025_s4 + $0xd0] sm:$0xff] }
 0x116   : > { %v801_v61 = vpop.f32.mrf.mxu0 }
 0x117   : > { %v913_v3 = vpop.f32.mrf.mxu1  ;;  %v813_v20 = vadd.f32 %v801_v61, %v700_v8  ;;  %v924_v37 = vadd.f32 %v911_v0, %v812_v24  ;;  %v1064_v8 = vld [vmem:[%s5024_s3 + $0x8] sm:$0x3f] }
 0x118   : > { %v803_v63 = vpop.f32.mrf.mxu0  ;;  %v2923_v24 = vld [vmem:[%s5025_s4 + $0xe8] sm:$0xff] }
 0x119   : > { %v915_v12 = vpop.f32.mrf.mxu1  ;;  %v814_v22 = vadd.f32 %v803_v63, %v702_v9  ;;  %v925_v34 = vadd.f32 %v913_v3, %v813_v20  ;;  %v2907_v9 = vld [vmem:[%s5024_s3 + $0x10] sm:$0xff]  ;;  %v2926_v20 = vld [vmem:[%s5025_s4 + $0x100] sm:$0xff] }
 0x11a   : > { %v805_v1 = vpop.f32.mrf.mxu0 }
 0x11b   : > { %v815_v13 = vadd.f32 %v805_v1, %v704_v19  ;;  %v917_v30 = vpop.f32.mrf.mxu1  ;;  %v926_v35 = vadd.f32 %v915_v12, %v814_v22  ;;  %v2929_v12 = vld [vmem:[%s5025_s4 + $0x118] sm:$0xff]  ;;  %v2927_v19 = vld [vmem:[%s5025_s4 + $0x108] sm:$0xff] }
 0x11c   : > { %v2925_v22 = vld [vmem:[%s5025_s4 + $0xf8] sm:$0xff] }
 0x11d   : > { %v927_v41 = vadd.f32 %v917_v30, %v815_v13  ;;  %v2919_v13 = vld [vmem:[%s5025_s4 + $0xc8] sm:$0xff] }
 0x11e   : > { %v1247_v30 = vld [vmem:[%s5025_s4 + $0x8] sm:$0xff] }
 0x11f   : > { %1303 = vmatpush1.msra.mxu0 %v1247_v30  ;;  %v1460_v30 = vld [vmem:[%s5026_s5 + $0x58] sm:$0xff] }
 0x120   : > { %1304 = vmatprep.subr.mxu0 %v3373_v27 }
 0x121   : > { %1305 = vmatpush1.msra.mxu0 %v1246_v33 }
 0x122   : > { %1328 = vmatprep.subr.mxu0 %v3373_v27 }
 0x124   : > { %v1009_v2 = vpop.f32.mrf.mxu0 }
 0x125   : > { %v1028_v57 = vadd.f32 %v1009_v2, %v920_v50  ;;  %v1469_v50 = vld [vmem:[%s5026_s5 + $0xa0] sm:$0xf] }
 0x126   : > { %v1011_v5 = vpop.f32.mrf.mxu0 }
 0x127   : > { %v1029_v53 = vadd.f32 %v1011_v5, %v921_v46  ;;  %v1047_v1 = vadd.f32 %v1040_v43, %v1028_v57  ;;  %v1468_v57 = vld [vmem:[%s5026_s5 + $0x98] sm:$0xff] }
 0x128   : > { %v1013_v6 = vpop.f32.mrf.mxu0 }
 0x129   : > { %v1030_v51 = vadd.f32 %v1013_v6, %v922_v42  ;;  %v1048_v0 = vadd.f32 %v1044_v47, %v1029_v53  ;;  %v1055_v2 = vmax.f32 %v1047_v1, 0.0  ;;  %v1063_v6 = vld [vmem:[%s5024_s3] sm:$0xff]  ;;  %v2931_v42 = vld [vmem:[%s5025_s4 + $0x128] sm:$0xff]  ;;  %v1467_v1 = vld [vmem:[%s5026_s5 + $0x90] sm:$0xff] }
 0x12a   : > { %v1015_v15 = vpop.f32.mrf.mxu0 }
 0x12b   : > { %v1031_v48 = vadd.f32 %v1015_v15, %v923_v40  ;;  %v1049_v62 = vadd.f32 %v1040_v43, %v1030_v51  ;;  %v1056_v5 = vmax.f32 %v1048_v0, 0.0  ;;  %v2908_v15 = vld [vmem:[%s5024_s3 + $0x18] sm:$0x3f]  ;;  %v2958_v51 = vld [vmem:[%s5026_s5 + $0x150] sm:$0xf] }
 0x12c   : > { %v1019_v25 = vpop.f32.mrf.mxu0  ;;  %v2933_v40 = vld [vmem:[%s5025_s4 + $0x138] sm:$0xff] }
 0x12d   : > { %v1032_v44 = vadd.f32 %v1019_v25, %v924_v37  ;;  %v1050_v60 = vadd.f32 %v1044_v47, %v1031_v48  ;;  %v1057_v4 = vmax.f32 %v1049_v62, 0.0  ;;  %v2922_v25 = vld [vmem:[%s5025_s4 + $0xe0] sm:$0xff] }
 0x12e   : > { %v1021_v32 = vpop.f32.mrf.mxu0  ;;  %v2934_v37 = vld [vmem:[%s5025_s4 + $0x140] sm:$0xff] }
 0x12f   : > { %v1033_v21 = vadd.f32 %v1021_v32, %v925_v34  ;;  %v1051_v59 = vadd.f32 %v1040_v43, %v1032_v44  ;;  %v1058_v56 = vmax.f32 %v1050_v60, 0.0  ;;  %v2916_v32 = vld [vmem:[%s5025_s4 + $0xb0] sm:$0xff]  ;;  %v2915_v34 = vld [vmem:[%s5025_s4 + $0xa8] sm:$0xff]  ;;  %v2955_v60 = vld [vmem:[%s5026_s5 + $0x138] sm:$0xff] }
 0x130   : > { %v1023_v39 = vpop.f32.mrf.mxu0 }
 0x131   : > { %v1034_v38 = vadd.f32 %v1023_v39, %v926_v35  ;;  %v1052_v54 = vadd.f32 %v1044_v47, %v1033_v21  ;;  %v1059_v3 = vmax.f32 %v1051_v59, 0.0  ;;  %v1266_v35 = vld [vmem:[%s5025_s4 + $0xa0] sm:$0xff]  ;;  %v1264_v39 = vld [vmem:[%s5025_s4 + $0x90] sm:$0xff]  ;;  %v1517_v59 = vpack.c.bf16 %v2958_v51, %v2958_v51 }
 0x132   : > { %v1025_v45 = vpop.f32.mrf.mxu0  ;;  %1329 = vmatpush2.msra.mxu0 %v1266_v35  ;;  %v2932_v21 = vld [vmem:[%s5025_s4 + $0x130] sm:$0xff]  ;;  %v1457_v35 = vld [vmem:[%s5026_s5 + $0x40] sm:$0xff] }
 0x133   : > { %v1035_v49 = vadd.f32 %v1025_v45, %v927_v41  ;;  %v1053_v52 = vadd.f32 %v1040_v43, %v1034_v38  ;;  %v1060_v58 = vmax.f32 %v1052_v54, 0.0  ;;  %1330 = vmatprep.subr.mxu0 %v3373_v27  ;;  %v1263_v41 = vld [vmem:[%s5025_s4 + $0x88] sm:$0xff]  ;;  %v1262_v38 = vld [vmem:[%s5025_s4 + $0x80] sm:$0xff]  ;;  %v2959_v45 = vld [vmem:[%s5026_s5 + $0x158] sm:$0xf]  ;;  %v1482_v54 = vpack.c.bf16 %v1469_v50, %v1469_v50 }
 0x134   : > { %1331 = vmatpush2.msra.mxu0 %v1265_v17  ;;  %v1470_v43 = vld [vmem:[%s5026_s5 + $0xa8] sm:$0xf]  ;;  %v1518_v46 = vpack.c.bf16 %v2959_v45, %v2959_v45  ;;  %v2946_v45 = vld [vmem:[%s5026_s5 + $0xf0] sm:$0xff]  ;;  %v1449_v51 = vld [vmem:[%s5026_s5] sm:$0xff] }
 0x135   : > { %v1054_v55 = vadd.f32 %v1044_v47, %v1035_v49  ;;  %v1061_v63 = vmax.f32 %v1053_v52, 0.0  ;;  %1332 = vmatprep.subr.mxu0 %v3373_v27  ;;  %v1483_v44 = vpack.c.bf16 %v1470_v43, %v1470_v43  ;;  %v2949_v43 = vld [vmem:[%s5026_s5 + $0x108] sm:$0xff] }
 0x136   : > { %1333 = vmatpush2.msra.mxu0 %v1264_v39  ;;  %v1456_v39 = vld [vmem:[%s5026_s5 + $0x38] sm:$0xff] }
 0x137   : > { %v1062_v61 = vmax.f32 %v1054_v55, 0.0  ;;  %1334 = vmatprep.subr.mxu0 %v3373_v27  ;;  %v1466_v55 = vld [vmem:[%s5026_s5 + $0x88] sm:$0xff] }
 0x138   : > { %1335 = vmatpush2.msra.mxu0 %v1263_v41  ;;  %v1481_v0 = vpack.c.bf16 %v1468_v57, %v1466_v55  ;;  %v1453_v41 = vld [vmem:[%s5026_s5 + $0x20] sm:$0xff]  ;;  %v2945_v55 = vld [vmem:[%s5026_s5 + $0xe8] sm:$0xff] }
 0x139   : > { %2903 = vmatprep.subr.msk.mxu1 %vm1072_vm5, %v1062_v61  ;;  %1336 = vmatprep.subr.mxu0 %v3373_v27 }
 0x13a   : > { %2904 = vmatpush1.msk.msra.mxu1 %vm1072_vm5, %v1061_v63  ;;  %1337 = vmatpush2.msra.mxu0 %v1262_v38 }
 0x13b   : > { %1105 = vmatprep.subr.mxu1 %v1060_v58  ;;  %2960 = vmatprep.subr.msk.bf16.mxu0 %vm1530_vm7, %v1518_v46  ;;  %v2948_v46 = vld [vmem:[%s5026_s5 + $0x100] sm:$0xff] }
 0x13c   : > { %1106 = vmatpush1.msra.mxu1 %v1059_v3 }
 0x13d   : > { %1107 = vmatprep.subr.mxu1 %v1058_v56 }
 0x13e   : > { %1108 = vmatpush1.msra.mxu1 %v1057_v4 }
 0x13f   : > { %1109 = vmatprep.subr.mxu1 %v1056_v5 }
 0x140   : > { %1110 = vmatpush1.msra.mxu1 %v1055_v2 }
 0x141   : > { %2905 = vmatmul.mubr.msk.f32.vlgmr.msra.gmra.mxu1 %vm1065_vm6, %v1063_v6  ;;  %2909 = vmatprep.subr.msk.mxu1 %vm1072_vm5, %v1062_v61  ;;  %v2957_v61 = vld [vmem:[%s5026_s5 + $0x148] sm:$0xff] }
 0x142   : > { %2910 = vmatpush1.msk.msra.mxu1 %vm1072_vm5, %v1061_v63  ;;  %1149 = vmatprep.mubr.f32.mxu1 %v3373_v27  ;;  %v1516_v6 = vpack.c.bf16 %v2957_v61, %v2955_v60  ;;  %v2944_v60 = vld [vmem:[%s5026_s5 + $0xe0] sm:$0xff] }
 0x143   : > { %1191 = vmatprep.subr.mxu1 %v1060_v58  ;;  %v1465_v58 = vld [vmem:[%s5026_s5 + $0x80] sm:$0xff] }
 0x144   : > { %1192 = vmatpush1.msra.mxu1 %v1059_v3 }
 0x145   : > { %2906 = vmatmul.mubr.msk.f32.gmra.mxu1 %vm1065_vm6, %v1064_v8  ;;  %1193 = vmatprep.subr.mxu1 %v1058_v56  ;;  %v2954_v8 = vld [vmem:[%s5026_s5 + $0x130] sm:$0xff] }
 0x146   : > { %1194 = vmatpush1.msra.mxu1 %v1057_v4  ;;  %1229 = vmatprep.mubr.f32.mxu1 %v3373_v27  ;;  %v1583_v4 = vsel %vm1530_vm7, %v1482_v54, 0  ;;  %v2943_v54 = vld [vmem:[%s5026_s5 + $0xd8] sm:$0xff] }
 0x147   : > { %1195 = vmatprep.subr.mxu1 %v1056_v5  ;;  %v1532_v5 = vsel %vm1530_vm7, %v1517_v59, 0  ;;  %v1510_v57 = vpack.c.bf16 %v2945_v55, %v2943_v54  ;;  %v2942_v59 = vld [vmem:[%s5026_s5 + $0xd0] sm:$0xff]  ;;  %v2998_v55 = vld [vmem:[%s5026_s5 + $0x260] sm:$0xff] }
 0x148   : > { %1196 = vmatpush1.msra.mxu1 %v1055_v2  ;;  %v1462_v2 = vld [vmem:[%s5026_s5 + $0x68] sm:$0xff]  ;;  %v1509_v61 = vpack.c.bf16 %v2944_v60, %v2942_v59  ;;  %v2996_v54 = vld [vmem:[%s5026_s5 + $0x250] sm:$0xff]  ;;  %v2993_v59 = vld [vmem:[%s5026_s5 + $0x238] sm:$0xff] }
 0x149   : > { %2911 = vmatmul.mubr.msk.f32.vlgmr.msra.gmra.mxu1 %vm1065_vm6, %v2907_v9  ;;  %1371 = vmatprep.subr.mxu1 %v3373_v27  ;;  %v2956_v9 = vld [vmem:[%s5026_s5 + $0x140] sm:$0xff]  ;;  %v2995_v60 = vld [vmem:[%s5026_s5 + $0x248] sm:$0xff] }
 0x14a   : > { %1235 = vmatprep.mubr.f32.mxu1 %v3373_v27  ;;  %1372 = vmatpush1.msra.mxu1 %v2930_v11  ;;  %v1464_v11 = vld [vmem:[%s5026_s5 + $0x78] sm:$0xff] }
 0x14b   : > { %1373 = vmatprep.subr.mxu1 %v3373_v27 }
 0x14c   : > { %1374 = vmatpush1.msra.mxu1 %v2929_v12  ;;  %v2951_v12 = vld [vmem:[%s5026_s5 + $0x118] sm:$0xff] }
 0x14d   : > { %2912 = vmatmul.mubr.msk.f32.gmra.mxu1 %vm1065_vm6, %v2908_v15  ;;  %1375 = vmatprep.subr.mxu1 %v3373_v27  ;;  %v2953_v15 = vld [vmem:[%s5026_s5 + $0x128] sm:$0xff] }
 0x14e   : > { %1376 = vmatpush1.msra.mxu1 %v2928_v18 }
 0x14f   : > { %1377 = vmatprep.subr.mxu1 %v3373_v27 }
 0x150   : > { %1378 = vmatpush1.msra.mxu1 %v2927_v19 }
 0x151   : > { %1379 = vmatprep.subr.mxu1 %v3373_v27 }
 0x152   : > { %1380 = vmatpush1.msra.mxu1 %v2926_v20  ;;  %v1480_v20 = vpack.c.bf16 %v1467_v1, %v1465_v58  ;;  %v2941_v58 = vld [vmem:[%s5026_s5 + $0xc8] sm:$0xff] }
 0x153   : > { %1381 = vmatprep.subr.mxu1 %v3373_v27 }
 0x154   : > { %1382 = vmatpush1.msra.mxu1 %v2925_v22  ;;  %v1461_v22 = vld [vmem:[%s5026_s5 + $0x60] sm:$0xff] }
 0x155   : > { %1383 = vmatprep.subr.mxu1 %v3373_v27 }
 0x156   : > { %1384 = vmatpush1.msra.mxu1 %v2924_v23  ;;  %v1515_v23 = vpack.c.bf16 %v2956_v9, %v2954_v8  ;;  %v3008_v9 = vld [vmem:[%s5026_s5 + $0x2b0] sm:$0xf] }
 0x157   : > { %1385 = vmatprep.subr.mxu1 %v3373_v27 }
 0x158   : > { %1386 = vmatpush1.msra.mxu1 %v2923_v24 }
 0x159   : > { %1387 = vmatprep.subr.mxu1 %v3373_v27 }
 0x15a   : > { %1388 = vmatpush1.msra.mxu1 %v2922_v25  ;;  %v1479_v25 = vpack.c.bf16 %v1464_v11, %v1462_v2 }
 0x15b   : > { %1389 = vmatprep.subr.mxu1 %v3373_v27 }
 0x15c   : > { %1390 = vmatpush1.msra.mxu1 %v2921_v26  ;;  %v1463_v26 = vld [vmem:[%s5026_s5 + $0x70] sm:$0xff] }
 0x15d   : > { %1391 = vmatprep.subr.mxu1 %v3373_v27 }
 0x15e   : > { %1392 = vmatpush1.msra.mxu1 %v2920_v10  ;;  %v1514_v10 = vpack.c.bf16 %v2953_v15, %v2951_v12  ;;  %v1757_v15 = vpack.c.bf16 %v3008_v9, %v3008_v9  ;;  %v2972_v9 = vld [vmem:[%s5026_s5 + $0x1a0] sm:$0xff] }
 0x15f   : > { %1393 = vmatprep.subr.mxu1 %v3373_v27 }
 0x160   : > { %1394 = vmatpush1.msra.mxu1 %v2919_v13  ;;  %v2950_v13 = vld [vmem:[%s5026_s5 + $0x110] sm:$0xff] }
 0x161   : > { %1395 = vmatprep.subr.mxu1 %v3373_v27 }
 0x162   : > { %1396 = vmatpush1.msra.mxu1 %v2918_v28  ;;  %v2952_v28 = vld [vmem:[%s5026_s5 + $0x120] sm:$0xff] }
 0x163   : > { %1397 = vmatprep.subr.mxu1 %v3373_v27  ;;  %v1513_v33 = vpack.c.bf16 %v2952_v28, %v2950_v13  ;;  %v1766_v28 = vsel %vm1530_vm7, %v1757_v15, 0  ;;  %v2969_v15 = vld [vmem:[%s5026_s5 + $0x188] sm:$0xff] }
 0x164   : > { %1398 = vmatpush1.msra.mxu1 %v2917_v29  ;;  %v1458_v29 = vld [vmem:[%s5026_s5 + $0x48] sm:$0xff] }
 0x165   : > { %1399 = vmatprep.subr.mxu1 %v3373_v27 }
 0x166   : > { %1400 = vmatpush1.msra.mxu1 %v2916_v32  ;;  %v1478_v32 = vpack.c.bf16 %v1463_v26, %v1461_v22  ;;  %v3007_v22 = vld [vmem:[%s5026_s5 + $0x2a8] sm:$0xff] }
 0x167   : > { %1401 = vmatprep.subr.mxu1 %v3373_v27 }
 0x168   : > { %1402 = vmatpush1.msra.mxu1 %v2915_v34  ;;  %v1477_v34 = vpack.c.bf16 %v1460_v30, %v1458_v29  ;;  %v3004_v30 = vld [vmem:[%s5026_s5 + $0x290] sm:$0xff] }
 0x169   : > { %1425 = vmatprep.subr.mxu1 %v3373_v27 }
 0x16a   : > { %1426 = vmatpush2.msra.mxu1 %v2935_v36  ;;  %v1459_v36 = vld [vmem:[%s5026_s5 + $0x50] sm:$0xff] }
 0x16b   : > { %1427 = vmatprep.subr.mxu1 %v3373_v27  ;;  %v1476_v17 = vpack.c.bf16 %v1459_v36, %v1457_v35 }
 0x16c   : > { %1428 = vmatpush2.msra.mxu1 %v2934_v37  ;;  %v1454_v37 = vld [vmem:[%s5026_s5 + $0x28] sm:$0xff] }
 0x16d   : > { %1429 = vmatprep.subr.mxu1 %v3373_v27 }
 0x16e   : > { %1430 = vmatpush2.msra.mxu1 %v2933_v40  ;;  %v1475_v40 = vpack.c.bf16 %v1456_v39, %v1454_v37  ;;  %v2981_v37 = vld [vmem:[%s5026_s5 + $0x1e8] sm:$0xff]  ;;  %v2983_v39 = vld [vmem:[%s5026_s5 + $0x1f8] sm:$0xff] }
 0x16f   : > { %1431 = vmatprep.subr.mxu1 %v3373_v27 }
 0x170   : > { %1432 = vmatpush2.msra.mxu1 %v2932_v21  ;;  %v1455_v21 = vld [vmem:[%s5026_s5 + $0x30] sm:$0xff] }
 0x171   : > { %1433 = vmatprep.subr.mxu1 %v3373_v27  ;;  %v1474_v38 = vpack.c.bf16 %v1455_v21, %v1453_v41 }
 0x172   : > { %1434 = vmatpush2.msra.mxu1 %v2931_v42  ;;  %v2947_v42 = vld [vmem:[%s5026_s5 + $0xf8] sm:$0xff] }
 0x173   : > { %2962 = vmatprep.subr.msk.bf16.mxu1 %vm1530_vm7, %v1483_v44  ;;  %v1512_v44 = vpack.c.bf16 %v2949_v43, %v2947_v42  ;;  %v3002_v42 = vld [vmem:[%s5026_s5 + $0x280] sm:$0xff]  ;;  %v2997_v43 = vld [vmem:[%s5026_s5 + $0x258] sm:$0xff] }
 0x201   : > { %v1145_v47 = vpop.f32.mrf.mxu1 }
 0x203   : > { %v1147_v48 = vpop.f32.mrf.mxu1 }
 0x205   : > { %v1151_v49 = vpop.f32.mrf.mxu1 }
 0x207   : > { %v1153_v52 = vpop.f32.mrf.mxu1 }
 0x209   : > { %v1231_v53 = vpop.f32.mrf.mxu1 }
 0x20a   : > { %v1242_v3 = vmax.f32 %v1145_v47, %v1231_v53  ;;  %v1511_v47 = vpack.c.bf16 %v2948_v46, %v2946_v45 }
 0x20b   : > { %v1233_v62 = vpop.f32.mrf.mxu1 }
 0x20c   : > { %v1243_v63 = vmax.f32 %v1147_v48, %v1233_v62  ;;  %v1450_v48 = vld [vmem:[%s5026_s5 + $0x8] sm:$0xff]  ;;  %v3009_v62 = vld [vmem:[%s5026_s5 + $0x2b8] sm:$0xf] }
 0x20d   : > { %v1237_v56 = vpop.f32.mrf.mxu1 }
 0x20e   : > { %2913 = vmatprep.mubr.msk.f32.mxu0 %vm1267_vm8, %v1243_v63  ;;  %2936 = vmatprep.mubr.msk.f32.mxu1 %vm1267_vm8, %v1243_v63  ;;  %v1244_v24 = vmax.f32 %v1151_v49, %v1237_v56  ;;  %v1452_v49 = vld [vmem:[%s5026_s5 + $0x18] sm:$0xff]  ;;  %v1758_v63 = vpack.c.bf16 %v3009_v62, %v3009_v62  ;;  %v2940_v56 = vld [vmem:[%s5026_s5 + $0xc0] sm:$0xff] }
 0x20f   : > { %v1239_v18 = vpop.f32.mrf.mxu1  ;;  %1339 = vmatmul.mubr.f32.vlgmr.msra.gmra.mxu0 %v1242_v3  ;;  %1436 = vmatmul.mubr.f32.vlgmr.msra.gmra.mxu1 %v1242_v3  ;;  %v1473_v50 = vpack.c.bf16 %v1452_v49, %v1450_v48  ;;  %v2938_v3 = vld [vmem:[%s5026_s5 + $0xb0] sm:$0xff]  ;;  %v2980_v48 = vld [vmem:[%s5026_s5 + $0x1e0] sm:$0xff] }
 0x210   : > { %v1245_v19 = vmax.f32 %v1153_v52, %v1239_v18  ;;  %1593 = vmatpush1.bf16.msra.mxu1 %v1583_v4  ;;  %1542 = vmatpush1.bf16.msra.mxu0 %v1532_v5  ;;  %v1451_v52 = vld [vmem:[%s5026_s5 + $0x10] sm:$0xff]  ;;  %v1507_v4 = vpack.c.bf16 %v2940_v56, %v2938_v3  ;;  %v2985_v5 = vld [vmem:[%s5026_s5 + $0x208] sm:$0xf]  ;;  %v2976_v62 = vld [vmem:[%s5026_s5 + $0x1c0] sm:$0xff]  ;;  %v1750_v3 = vpack.c.bf16 %v2995_v60, %v2993_v59 }
 0x211   : > { %1594 = vmatprep.subr.bf16.mxu1 %v1481_v0  ;;  %1543 = vmatprep.subr.bf16.mxu0 %v1516_v6  ;;  %v1472_v53 = vpack.c.bf16 %v1451_v52, %v1449_v51  ;;  %v2939_v0 = vld [vmem:[%s5026_s5 + $0xb8] sm:$0xff]  ;;  %v1665_v2 = vpack.c.bf16 %v2985_v5, %v2985_v5  ;;  %v2982_v49 = vld [vmem:[%s5026_s5 + $0x1f0] sm:$0xff]  ;;  %v2977_v51 = vld [vmem:[%s5026_s5 + $0x1c8] sm:$0xff] }
 0x212   : > { %2914 = vmatprep.mubr.msk.f32.mxu0 %vm1267_vm8, %v1245_v19  ;;  %2937 = vmatprep.mubr.msk.f32.mxu1 %vm1267_vm8, %v1245_v19  ;;  %v1508_v1 = vpack.c.bf16 %v2941_v58, %v2939_v0  ;;  %v2979_v52 = vld [vmem:[%s5026_s5 + $0x1d8] sm:$0xff]  ;;  %v1751_v0 = vpack.c.bf16 %v2998_v55, %v2996_v54  ;;  %v2973_v58 = vld [vmem:[%s5026_s5 + $0x1a8] sm:$0xff]  ;;  %v2992_v56 = vld [vmem:[%s5026_s5 + $0x230] sm:$0xff] }
 0x213   : > { %1344 = vmatmul.mubr.f32.gmra.mxu0 %v1244_v24  ;;  %1441 = vmatmul.mubr.f32.gmra.mxu1 %v1244_v24  ;;  %v3021_v54 = vld [vmem:[%s5026_s5 + $0x308] sm:$0xff]  ;;  %v3023_v55 = vld [vmem:[%s5026_s5 + $0x318] sm:$0xff]  ;;  %v3020_v59 = vld [vmem:[%s5026_s5 + $0x300] sm:$0xff] }
 0x214   : > { %1595 = vmatpush1.bf16.msra.mxu1 %v1480_v20  ;;  %1544 = vmatpush1.bf16.msra.mxu0 %v1515_v23  ;;  %v3005_v20 = vld [vmem:[%s5026_s5 + $0x298] sm:$0xff]  ;;  %v3022_v60 = vld [vmem:[%s5026_s5 + $0x310] sm:$0xff] }
 0x215   : > { %1596 = vmatprep.subr.bf16.mxu1 %v1479_v25  ;;  %1545 = vmatprep.subr.bf16.mxu0 %v1514_v10  ;;  %v2984_v10 = vld [vmem:[%s5026_s5 + $0x200] sm:$0xf]  ;;  %v1756_v29 = vpack.c.bf16 %v3007_v22, %v3005_v20  ;;  %v2988_v20 = vld [vmem:[%s5026_s5 + $0x210] sm:$0xff] }
 0x216   : > { %1620 = vmatprep.mubr.bf16.mxu1 %v3372_v7  ;;  %1569 = vmatprep.mubr.bf16.mxu0 %v3372_v7  ;;  %v1664_v36 = vpack.c.bf16 %v2984_v10, %v2984_v10  ;;  %v2990_v22 = vld [vmem:[%s5026_s5 + $0x220] sm:$0xff] }
 0x217   : > { %v1747_v10 = vpack.c.bf16 %v2990_v22, %v2988_v20  ;;  %v3053_v20 = vld [vmem:[%s5029_s8 + $0xe8] sm:$0xff]  ;;  %v3052_v22 = vld [vmem:[%s5029_s8 + $0xe0] sm:$0xff] }
 0x218   : > { %1597 = vmatpush1.bf16.msra.mxu1 %v1478_v32  ;;  %1546 = vmatpush1.bf16.msra.mxu0 %v1513_v33  ;;  %v3006_v32 = vld [vmem:[%s5026_s5 + $0x2a0] sm:$0xff]  ;;  %v3001_v33 = vld [vmem:[%s5026_s5 + $0x278] sm:$0xff]  ;;  %v1672_v46 = vsel %vm1530_vm7, %v1664_v36, 0 }
 0x219   : > { %1598 = vmatprep.subr.bf16.mxu1 %v1477_v34  ;;  %1547 = vmatprep.subr.bf16.mxu0 %v1512_v44  ;;  %v3003_v34 = vld [vmem:[%s5026_s5 + $0x288] sm:$0xff]  ;;  %v2964_v36 = vld [vmem:[%s5026_s5 + $0x160] sm:$0xff] }
 0x21a   : > { %v1754_v21 = vpack.c.bf16 %v3003_v34, %v3001_v33  ;;  %v2999_v44 = vld [vmem:[%s5026_s5 + $0x268] sm:$0xff] }
 0x21c   : > { %1599 = vmatpush1.bf16.msra.mxu1 %v1476_v17  ;;  %1548 = vmatpush1.bf16.msra.mxu0 %v1511_v47  ;;  %v1755_v17 = vpack.c.bf16 %v3006_v32, %v3004_v30  ;;  %v1663_v47 = vpack.c.bf16 %v2983_v39, %v2981_v37  ;;  %v3033_v37 = vld [vmem:[%s5026_s5 + $0x368] sm:$0xf] }
 0x21d   : > { %1600 = vmatprep.subr.bf16.mxu1 %v1475_v40  ;;  %1549 = vmatprep.subr.bf16.mxu0 %v1510_v57  ;;  %v1662_v57 = vpack.c.bf16 %v2982_v49, %v2980_v48  ;;  %v3025_v48 = vld [vmem:[%s5026_s5 + $0x328] sm:$0xff]  ;;  %v3027_v49 = vld [vmem:[%s5026_s5 + $0x338] sm:$0xff] }
 0x220   : > { %1601 = vmatpush1.bf16.msra.mxu1 %v1474_v38  ;;  %1550 = vmatpush1.bf16.msra.mxu0 %v1509_v61  ;;  %v3000_v38 = vld [vmem:[%s5026_s5 + $0x270] sm:$0xff]  ;;  %v1661_v61 = vpack.c.bf16 %v2979_v52, %v2977_v51  ;;  %v1848_v51 = vpack.c.bf16 %v3027_v49, %v3025_v48  ;;  %v3024_v52 = vld [vmem:[%s5026_s5 + $0x320] sm:$0xff] }
 0x221   : > { %1602 = vmatprep.subr.bf16.mxu1 %v1473_v50  ;;  %1551 = vmatprep.subr.bf16.mxu0 %v1508_v1  ;;  %v1753_v50 = vpack.c.bf16 %v3002_v42, %v3000_v38  ;;  %v2975_v1 = vld [vmem:[%s5026_s5 + $0x1b8] sm:$0xff]  ;;  %v3029_v38 = vld [vmem:[%s5026_s5 + $0x348] sm:$0xff] }
 0x222   : > { %v3031_v42 = vld [vmem:[%s5026_s5 + $0x358] sm:$0xff] }
 0x224   : > { %1603 = vmatpush1.bf16.msra.mxu1 %v1472_v53  ;;  %1552 = vmatpush1.bf16.msra.mxu0 %v1507_v4  ;;  %v1752_v53 = vpack.c.bf16 %v2999_v44, %v2997_v43  ;;  %v2994_v4 = vld [vmem:[%s5026_s5 + $0x240] sm:$0xff] }
 0x225   : > { %3010 = vmatprep.subr.msk.bf16.mxu1 %vm1530_vm7, %v1758_v63  ;;  %2986 = vmatprep.subr.msk.bf16.mxu0 %vm1530_vm7, %v1665_v2  ;;  %v2978_v63 = vld [vmem:[%s5026_s5 + $0x1d0] sm:$0xff]  ;;  %v2989_v2 = vld [vmem:[%s5026_s5 + $0x218] sm:$0xff] }
 0x226   : > { %v1660_v5 = vpack.c.bf16 %v2978_v63, %v2976_v62  ;;  %v3019_v62 = vld [vmem:[%s5026_s5 + $0x2f8] sm:$0xff]  ;;  %v1845_v63 = vpack.c.bf16 %v3022_v60, %v3020_v59 }
 0x2cf   : > { %v1340_v6 = vpop.f32.mrf.mxu0  ;;  %v1437_v8 = vpop.f32.mrf.mxu1 }
 0x2d0   : > { %v1446_v23 = vmax.f32 %v1340_v6, %v1437_v8  ;;  %v2991_v6 = vld [vmem:[%s5026_s5 + $0x228] sm:$0xff]  ;;  %v1659_v8 = vpack.c.bf16 %v2975_v1, %v2973_v58  ;;  %v3016_v58 = vld [vmem:[%s5026_s5 + $0x2e0] sm:$0xff]  ;;  %v3018_v1 = vld [vmem:[%s5026_s5 + $0x2f0] sm:$0xff] }
 0x2d1   : > { %v1342_v11 = vpop.f32.mrf.mxu0  ;;  %v1439_v12 = vpop.f32.mrf.mxu1 }
 0x2d2   : > { %v2974_v11 = vld [vmem:[%s5026_s5 + $0x1b0] sm:$0xff]  ;;  %v1749_v12 = vpack.c.bf16 %v2994_v4, %v2992_v56  ;;  %v3015_v56 = vld [vmem:[%s5026_s5 + $0x2d8] sm:$0xff]  ;;  %v1843_v4 = vpack.c.bf16 %v3018_v1, %v3016_v58 }
 0x2d3   : > { %v1345_v18 = vpop.f32.mrf.mxu0  ;;  %v1442_v19 = vpop.f32.mrf.mxu1 }
 0x2d4   : > { %v1447_v24 = vmax.f32 %v1345_v18, %v1442_v19  ;;  %v2971_v18 = vld [vmem:[%s5026_s5 + $0x198] sm:$0xff]  ;;  %v1748_v19 = vpack.c.bf16 %v2991_v6, %v2989_v2  ;;  %v3012_v2 = vld [vmem:[%s5026_s5 + $0x2c0] sm:$0xff]  ;;  %v3014_v6 = vld [vmem:[%s5026_s5 + $0x2d0] sm:$0xff] }
 0x2d5   : > { %v1347_v25 = vpop.f32.mrf.mxu0  ;;  %v1444_v26 = vpop.f32.mrf.mxu1 }
 0x2d6   : > { %v4285_v13 = vpack.c.bf16 %v1447_v24, %v1446_v23  ;;  %v1658_v23 = vpack.c.bf16 %v2974_v11, %v2972_v9  ;;  %v1657_v24 = vpack.c.bf16 %v2971_v18, %v2969_v15  ;;  %v2968_v25 = vld [vmem:[%s5026_s5 + $0x180] sm:$0xff]  ;;  %v2970_v26 = vld [vmem:[%s5026_s5 + $0x190] sm:$0xff]  ;;  %v3059_v11 = vld [vmem:[%s5029_s8 + $0x118] sm:$0xff] }
 0x2d7   : > { %v1656_v33 = vpack.c.bf16 %v2970_v26, %v2968_v25  ;;  %v3056_v15 = vld [vmem:[%s5029_s8 + $0x100] sm:$0xff]  ;;  %v3055_v18 = vld [vmem:[%s5029_s8 + $0xf8] sm:$0xff]  ;;  %v3049_v25 = vld [vmem:[%s5029_s8 + $0xc8] sm:$0xff] }
 0x2d8   : > { %v1522_v35 = vshll.u32 %v4285_v13, 16  ;;  %2963 = vmatmul.mubr.msk.bf16.vlgmr.msra.gmra.mxu1 %vm1526_vm9, %v4285_v13  ;;  %v1520_v40 = vshrl.u32 %v4285_v13, 16  ;;  %v1667_v43 = vrot.slane %v4285_v13, 1  ;;  %v1853_v9 = vrot.slane %v4285_v13, 2  ;;  %v3057_v13 = vld [vmem:[%s5029_s8 + $0x108] sm:$0xff]  ;;  %v3048_v26 = vld [vmem:[%s5029_s8 + $0xc0] sm:$0xff] }
 0x2d9   : > { %1776 = vmatpush1.bf16.msra.mxu1 %v1766_v28  ;;  %1803 = vmatprep.mubr.bf16.mxu1 %v3372_v7  ;;  %v2965_v28 = vld [vmem:[%s5026_s5 + $0x168] sm:$0xff] }
 0x2da   : > { %v1524_v41 = vrot.slane %v1522_v35, 1  ;;  %1777 = vmatprep.subr.bf16.mxu1 %v1756_v29  ;;  %v2967_v29 = vld [vmem:[%s5026_s5 + $0x178] sm:$0xff]  ;;  %v1759_v30 = vrot.slane %v1520_v40, 1  ;;  %v1760_v32 = vrot.slane %v1522_v35, 2  ;;  %v3032_v35 = vld [vmem:[%s5026_s5 + $0x360] sm:$0xf] }
 0x2db   : > { %v1655_v34 = vpack.c.bf16 %v2967_v29, %v2965_v28  ;;  %v3046_v28 = vld [vmem:[%s5029_s8 + $0xb0] sm:$0xff]  ;;  %v3045_v29 = vld [vmem:[%s5029_s8 + $0xa8] sm:$0xff] }
 0x2dc   : > { %v1525_v45 = vor.u32 %v1524_v41, %v1520_v40  ;;  %v1761_v39 = vor.u32 %v1760_v32, %v1759_v30  ;;  %v1852_v41 = vpack.c.bf16 %v3033_v37, %v3033_v37 }
 0x2dd   : > { %1778 = vmatpush1.bf16.msra.mxu1 %v1755_v17  ;;  %v2966_v17 = vld [vmem:[%s5026_s5 + $0x170] sm:$0xff] }
 0x2de   : > { %2961 = vmatmul.mubr.msk.bf16.vlgmr.msra.gmra.mxu0 %vm1526_vm9, %v1525_v45  ;;  %1779 = vmatprep.subr.bf16.mxu1 %v1754_v21  ;;  %v1654_v40 = vpack.c.bf16 %v2966_v17, %v2964_v36  ;;  %v1851_v21 = vpack.c.bf16 %v3032_v35, %v3032_v35  ;;  %v1850_v45 = vpack.c.bf16 %v3031_v42, %v3029_v38 }
 0x2df   : > { %1682 = vmatpush1.bf16.msra.mxu0 %v1672_v46  ;;  %1709 = vmatprep.mubr.bf16.mxu0 %v3372_v7  ;;  %v3028_v46 = vld [vmem:[%s5026_s5 + $0x340] sm:$0xff] }
 0x2e0   : > { %1683 = vmatprep.subr.bf16.mxu0 %v1663_v47  ;;  %v1858_v44 = vsel %vm1530_vm7, %v1851_v21, 0  ;;  %v3030_v47 = vld [vmem:[%s5026_s5 + $0x350] sm:$0xff] }
 0x2e1   : > { %1780 = vmatpush1.bf16.msra.mxu1 %v1753_v50  ;;  %v1849_v50 = vpack.c.bf16 %v3030_v47, %v3028_v46 }
 0x2e2   : > { %1781 = vmatprep.subr.bf16.mxu1 %v1752_v53  ;;  %v3026_v53 = vld [vmem:[%s5026_s5 + $0x330] sm:$0xff] }
 0x2e3   : > { %1684 = vmatpush1.bf16.msra.mxu0 %v1662_v57  ;;  %v1846_v57 = vpack.c.bf16 %v3023_v55, %v3021_v54  ;;  %v1448_v54 = vld [vmem:[%s5027_s6] sm:$0x3] }
 0x2e4   : > { %1685 = vmatprep.subr.bf16.mxu0 %v1661_v61  ;;  %v3017_v61 = vld [vmem:[%s5026_s5 + $0x2e8] sm:$0xff]  ;;  %v1914_v1 = vrot.slane %v1448_v54, %v1039_v31  ;;  %v2104_v31 = vld [vmem:[%s5029_s8 + $0x78] sm:$0xff] }
 0x2e5   : > { %1782 = vmatpush1.bf16.msra.mxu1 %v1751_v0  ;;  %v1844_v0 = vpack.c.bf16 %v3019_v62, %v3017_v61  ;;  %v1918_v62 = vrot.slane %v1448_v54, %v1043_v16  ;;  %v1929_v16 = vld [vmem:[%s5028_s7] sm:$0x1f] }
 0x2e6   : > { %1783 = vmatprep.subr.bf16.mxu1 %v1750_v3  ;;  %v3013_v3 = vld [vmem:[%s5026_s5 + $0x2c8] sm:$0xff]  ;;  %v3071_v54 = vld [vmem:[%s5030_s9 + $0x80] sm:$0xff] }
 0x2e7   : > { %1686 = vmatpush1.bf16.msra.mxu0 %v1660_v5  ;;  %v1842_v5 = vpack.c.bf16 %v3015_v56, %v3013_v3 }
 0x2e8   : > { %1687 = vmatprep.subr.bf16.mxu0 %v1659_v8  ;;  %v1841_v8 = vpack.c.bf16 %v3014_v6, %v3012_v2 }
 0x2e9   : > { %1784 = vmatpush1.bf16.msra.mxu1 %v1749_v12  ;;  %v3058_v12 = vld [vmem:[%s5029_s8 + $0x110] sm:$0xff] }
 0x2ea   : > { %1785 = vmatprep.subr.bf16.mxu1 %v1748_v19  ;;  %v3054_v19 = vld [vmem:[%s5029_s8 + $0xf0] sm:$0xff] }
 0x2eb   : > { %1688 = vmatpush1.bf16.msra.mxu0 %v1658_v23  ;;  %v3051_v23 = vld [vmem:[%s5029_s8 + $0xd8] sm:$0xff] }
 0x2ec   : > { %1689 = vmatprep.subr.bf16.mxu0 %v1657_v24  ;;  %v3050_v24 = vld [vmem:[%s5029_s8 + $0xd0] sm:$0xff] }
 0x2ed   : > { %1786 = vmatpush1.bf16.msra.mxu1 %v1747_v10  ;;  %v3047_v10 = vld [vmem:[%s5029_s8 + $0xb8] sm:$0xff] }
 0x2ef   : > { %1690 = vmatpush1.bf16.msra.mxu0 %v1656_v33 }
 0x2f0   : > { %3011 = vmatmul.mubr.msk.bf16.vlgmr.msra.gmra.mxu1 %vm1526_vm9, %v1761_v39  ;;  %1691 = vmatprep.subr.bf16.mxu0 %v1655_v34 }
 0x2f1   : > { %2004 = vmatprep.mubr.f32.mxu1 %v3373_v27 }
 0x2f3   : > { %1692 = vmatpush1.bf16.msra.mxu0 %v1654_v40 }
 0x2f4   : > { %3034 = vmatprep.subr.msk.bf16.mxu0 %vm1530_vm7, %v1852_v41 }
 0x2f6   : > { %2987 = vmatmul.mubr.msk.bf16.vlgmr.msra.gmra.mxu0 %vm1526_vm9, %v1667_v43 }
 0x2f7   : > { %1868 = vmatpush1.bf16.msra.mxu0 %v1858_v44  ;;  %1895 = vmatprep.mubr.bf16.mxu0 %v3372_v7  ;;  %v1847_v7 = vpack.c.bf16 %v3026_v53, %v3024_v52 }
 0x2f8   : > { %1869 = vmatprep.subr.bf16.mxu0 %v1850_v45 }
 0x2fb   : > { %1870 = vmatpush1.bf16.msra.mxu0 %v1849_v50 }
 0x2fc   : > { %1871 = vmatprep.subr.bf16.mxu0 %v1848_v51 }
 0x2ff   : > { %1872 = vmatpush1.bf16.msra.mxu0 %v1847_v7 }
 0x300   : > { %1873 = vmatprep.subr.bf16.mxu0 %v1846_v57 }
 0x303   : > { %1874 = vmatpush1.bf16.msra.mxu0 %v1845_v63 }
 0x304   : > { %1875 = vmatprep.subr.bf16.mxu0 %v1844_v0 }
 0x307   : > { %1876 = vmatpush1.bf16.msra.mxu0 %v1843_v4 }
 0x308   : > { %1877 = vmatprep.subr.bf16.mxu0 %v1842_v5 }
 0x30b   : > { %1878 = vmatpush1.bf16.msra.mxu0 %v1841_v8 }
 0x30c   : > { %2204 = vmatprep.subr.mxu0 %v3373_v27 }
 0x30e   : > { %3035 = vmatmul.mubr.msk.bf16.vlgmr.msra.gmra.mxu0 %vm1526_vm9, %v1853_v9 }
 0x30f   : > { %2205 = vmatpush1.msra.mxu0 %v3059_v11 }
 0x310   : > { %2206 = vmatprep.subr.mxu0 %v3373_v27 }
 0x311   : > { %2207 = vmatpush1.msra.mxu0 %v3058_v12 }
 0x312   : > { %2208 = vmatprep.subr.mxu0 %v3373_v27 }
 0x313   : > { %2209 = vmatpush1.msra.mxu0 %v3057_v13  ;;  %v2103_v13 = vld [vmem:[%s5029_s8 + $0x70] sm:$0xff] }
 0x314   : > { %2210 = vmatprep.subr.mxu0 %v3373_v27 }
 0x315   : > { %2211 = vmatpush1.msra.mxu0 %v3056_v15  ;;  %v2102_v15 = vld [vmem:[%s5029_s8 + $0x68] sm:$0xff] }
 0x316   : > { %2212 = vmatprep.subr.mxu0 %v3373_v27 }
 0x317   : > { %2213 = vmatpush1.msra.mxu0 %v3055_v18  ;;  %v2101_v18 = vld [vmem:[%s5029_s8 + $0x60] sm:$0xff] }
 0x318   : > { %2214 = vmatprep.subr.mxu0 %v3373_v27 }
 0x319   : > { %2215 = vmatpush1.msra.mxu0 %v3054_v19  ;;  %v2100_v19 = vld [vmem:[%s5029_s8 + $0x58] sm:$0xff] }
 0x31a   : > { %2216 = vmatprep.subr.mxu0 %v3373_v27 }
 0x31b   : > { %2217 = vmatpush1.msra.mxu0 %v3053_v20  ;;  %v2099_v20 = vld [vmem:[%s5029_s8 + $0x50] sm:$0xff] }
 0x31c   : > { %2218 = vmatprep.subr.mxu0 %v3373_v27 }
 0x31d   : > { %2219 = vmatpush1.msra.mxu0 %v3052_v22  ;;  %v2098_v22 = vld [vmem:[%s5029_s8 + $0x48] sm:$0xff] }
 0x31e   : > { %2220 = vmatprep.subr.mxu0 %v3373_v27 }
 0x31f   : > { %2221 = vmatpush1.msra.mxu0 %v3051_v23  ;;  %v2097_v23 = vld [vmem:[%s5029_s8 + $0x40] sm:$0xff] }
 0x320   : > { %2222 = vmatprep.subr.mxu0 %v3373_v27 }
 0x321   : > { %2223 = vmatpush1.msra.mxu0 %v3050_v24  ;;  %v2096_v24 = vld [vmem:[%s5029_s8 + $0x38] sm:$0xff] }
 0x322   : > { %2224 = vmatprep.subr.mxu0 %v3373_v27 }
 0x323   : > { %2225 = vmatpush1.msra.mxu0 %v3049_v25  ;;  %v2095_v25 = vld [vmem:[%s5029_s8 + $0x30] sm:$0xff] }
 0x324   : > { %2226 = vmatprep.subr.mxu0 %v3373_v27 }
 0x325   : > { %2227 = vmatpush1.msra.mxu0 %v3048_v26  ;;  %v2094_v26 = vld [vmem:[%s5029_s8 + $0x28] sm:$0xff] }
 0x326   : > { %2228 = vmatprep.subr.mxu0 %v3373_v27 }
 0x327   : > { %2229 = vmatpush1.msra.mxu0 %v3047_v10  ;;  %v2093_v10 = vld [vmem:[%s5029_s8 + $0x20] sm:$0xff] }
 0x328   : > { %2230 = vmatprep.subr.mxu0 %v3373_v27 }
 0x329   : > { %2231 = vmatpush1.msra.mxu0 %v3046_v28  ;;  %v2092_v28 = vld [vmem:[%s5029_s8 + $0x18] sm:$0xff] }
 0x32a   : > { %2232 = vmatprep.subr.mxu0 %v3373_v27 }
 0x32b   : > { %2233 = vmatpush1.msra.mxu0 %v3045_v29  ;;  %v2091_v29 = vld [vmem:[%s5029_s8 + $0x10] sm:$0xff] }
 0x32c   : > { %2234 = vmatprep.subr.mxu0 %v3373_v27 }
 0x398   : > { %v1622_v33 = vpop.f32.mrf.mxu1 }
 0x39a   : > { %v1624_v36 = vpop.f32.mrf.mxu1 }
 0x39c   : > { %v1626_v37 = vpop.f32.mrf.mxu1 }
 0x39e   : > { %v1571_v30 = vpop.f32.mrf.mxu0  ;;  %v1628_v39 = vpop.f32.mrf.mxu1 }
 0x39f   : > { %v1623_v44 = vadd.f32 %v1622_v33, %v1571_v30  ;;  %v2090_v30 = vld [vmem:[%s5029_s8 + $0x8] sm:$0xff]  ;;  %v3044_v33 = vld [vmem:[%s5029_s8 + $0xa0] sm:$0xff] }
 0x3a0   : > { %v1573_v32 = vpop.f32.mrf.mxu0  ;;  %2235 = vmatpush1.msra.mxu0 %v3044_v33  ;;  %v3092_v33 = vld [vmem:[%s5030_s9 + $0x110] sm:$0xff] }
 0x3a1   : > { %v1625_v42 = vadd.f32 %v1624_v36, %v1573_v32  ;;  %v2089_v32 = vld [vmem:[%s5029_s8] sm:$0xff]  ;;  %2260 = vmatprep.subr.mxu0 %v3373_v27  ;;  %v3063_v36 = vld [vmem:[%s5029_s8 + $0x138] sm:$0xff] }
 0x3a2   : > { %v1575_v34 = vpop.f32.mrf.mxu0  ;;  %2261 = vmatpush2.msra.mxu0 %v3063_v36 }
 0x3a3   : > { %v1627_v43 = vadd.f32 %v1626_v37, %v1575_v34  ;;  %v2108_v34 = vld [vmem:[%s5029_s8 + $0x98] sm:$0xff]  ;;  %2262 = vmatprep.subr.mxu0 %v3373_v27  ;;  %v3062_v37 = vld [vmem:[%s5029_s8 + $0x130] sm:$0xff] }
 0x3a4   : > { %v1577_v17 = vpop.f32.mrf.mxu0  ;;  %2263 = vmatpush2.msra.mxu0 %v3062_v37  ;;  %v3082_v37 = vld [vmem:[%s5030_s9 + $0xc8] sm:$0xff] }
 0x3a5   : > { %v1629_v46 = vadd.f32 %v1628_v39, %v1577_v17  ;;  %v2107_v17 = vld [vmem:[%s5029_s8 + $0x90] sm:$0xff]  ;;  %2264 = vmatprep.subr.mxu0 %v3373_v27  ;;  %v3061_v39 = vld [vmem:[%s5029_s8 + $0x128] sm:$0xff] }
 0x3a6   : > { %2265 = vmatpush2.msra.mxu0 %v3061_v39  ;;  %v3090_v39 = vld [vmem:[%s5030_s9 + $0x100] sm:$0xff] }
 0x3a7   : > { %2266 = vmatprep.subr.mxu0 %v3373_v27 }
 0x3b0   : > { %v1805_v41 = vpop.f32.mrf.mxu1 }
 0x3b2   : > { %v1807_v38 = vpop.f32.mrf.mxu1 }
 0x3b4   : > { %v1809_v49 = vpop.f32.mrf.mxu1 }
 0x3b6   : > { %v1711_v35 = vpop.f32.mrf.mxu0  ;;  %v1811_v57 = vpop.f32.mrf.mxu1 }
 0x3b7   : > { %v1720_v50 = vadd.f32 %v1711_v35, %v1623_v44  ;;  %v2106_v35 = vld [vmem:[%s5029_s8 + $0x88] sm:$0xff] }
 0x3b8   : > { %v1713_v40 = vpop.f32.mrf.mxu0  ;;  %v2284_v44 = vld [vmem:[%s5030_s9 + $0x48] sm:$0xff] }
 0x3b9   : > { %v1721_v47 = vadd.f32 %v1713_v40, %v1625_v42  ;;  %v1814_v59 = vadd.f32 %v1805_v41, %v1720_v50  ;;  %v2105_v40 = vld [vmem:[%s5029_s8 + $0x80] sm:$0xff] }
 0x3ba   : > { %v1715_v21 = vpop.f32.mrf.mxu0  ;;  %v3060_v41 = vld [vmem:[%s5029_s8 + $0x120] sm:$0xff] }
 0x3bb   : > { %v1722_v48 = vadd.f32 %v1715_v21, %v1627_v43  ;;  %v1815_v55 = vadd.f32 %v1807_v38, %v1721_v47  ;;  %2267 = vmatpush2.msra.mxu0 %v3060_v41  ;;  %v2283_v42 = vld [vmem:[%s5030_s9 + $0x40] sm:$0xff] }
 0x3bc   : > { %v1717_v45 = vpop.f32.mrf.mxu0  ;;  %3176 = vmatprep.subr.bf16.mxu0 %v3373_v27 }
 0x3bd   : > { %v1723_v52 = vadd.f32 %v1717_v45, %v1629_v46  ;;  %v1816_v7 = vadd.f32 %v1809_v49, %v1722_v48  ;;  %v3073_v45 = vld [vmem:[%s5030_s9 + $0x90] sm:$0xff]  ;;  %v3074_v46 = vld [vmem:[%s5030_s9 + $0x98] sm:$0xff]  ;;  %v2290_v49 = vpack.c.bf16 %v2284_v44, %v2283_v42 }
 0x3be   : > { %v2306_v50 = vpack.c.bf16 %v3074_v46, %v3073_v45  ;;  %v3089_v44 = vld [vmem:[%s5030_s9 + $0xf8] sm:$0xff]  ;;  %v3077_v46 = vld [vmem:[%s5030_s9 + $0xa0] sm:$0xff] }
 0x3bf   : > { %v1817_v0 = vadd.f32 %v1811_v57, %v1723_v52 }
 0x3ce   : > { %v1897_v51 = vpop.f32.mrf.mxu0 }
 0x3cf   : > { %v1906_v58 = vadd.f32 %v1897_v51, %v1814_v59  ;;  %v2281_v51 = vld [vmem:[%s5030_s9 + $0x30] sm:$0xff]  ;;  %v2279_v59 = vld [vmem:[%s5030_s9 + $0x20] sm:$0xff] }
 0x3d0   : > { %v1899_v53 = vpop.f32.mrf.mxu0 }
 0x3d1   : > { %v1907_v61 = vadd.f32 %v1899_v53, %v1815_v55  ;;  %v1921_v6 = vadd.f32 %v1914_v1, %v1906_v58  ;;  %v2282_v53 = vld [vmem:[%s5030_s9 + $0x38] sm:$0xff]  ;;  %v3072_v55 = vld [vmem:[%s5030_s9 + $0x88] sm:$0xff]  ;;  %v2277_v58 = vld [vmem:[%s5030_s9 + $0x10] sm:$0xff] }
 0x3d2   : > { %v1901_v60 = vpop.f32.mrf.mxu0  ;;  %v2305_v57 = vpack.c.bf16 %v3072_v55, %v3071_v54  ;;  %v3105_v55 = vld [vmem:[%s5030_s9 + $0x170] sm:$0xff] }
 0x3d3   : > { %v1908_v63 = vadd.f32 %v1901_v60, %v1816_v7  ;;  %v1922_v5 = vadd.f32 %v1918_v62, %v1907_v61  ;;  %v1925_v12 = vmax.f32 %v1921_v6, 0.0  ;;  %v2289_v7 = vpack.c.bf16 %v2282_v53, %v2281_v51  ;;  %v2280_v60 = vld [vmem:[%s5030_s9 + $0x28] sm:$0xff]  ;;  %v3069_v61 = vld [vmem:[%s5030_s9 + $0x70] sm:$0xff] }
 0x3d4   : > { %v1903_v3 = vpop.f32.mrf.mxu0  ;;  %v2276_v6 = vld [vmem:[%s5030_s9 + $0x8] sm:$0xff] }
 0x3d5   : > { %v1909_v56 = vadd.f32 %v1903_v3, %v1817_v0  ;;  %v1923_v4 = vadd.f32 %v1914_v1, %v1908_v63  ;;  %v1926_v11 = vmax.f32 %v1922_v5, 0.0  ;;  %v2288_v63 = vpack.c.bf16 %v2280_v60, %v2279_v59  ;;  %v2278_v1 = vld [vmem:[%s5030_s9 + $0x18] sm:$0xff]  ;;  %v3067_v3 = vld [vmem:[%s5030_s9 + $0x60] sm:$0xff]  ;;  %v3108_v51 = vld [vmem:[%s5030_s9 + $0x188] sm:$0xff] }
 0x3d6   : > { %v3103_v59 = vld [vmem:[%s5030_s9 + $0x160] sm:$0xff]  ;;  %v3104_v60 = vld [vmem:[%s5030_s9 + $0x168] sm:$0xff] }
 0x3d7   : > { %v1924_v2 = vadd.f32 %v1918_v62, %v1909_v56  ;;  %v1927_v9 = vmax.f32 %v1923_v4, 0.0  ;;  %v3070_v62 = vld [vmem:[%s5030_s9 + $0x78] sm:$0xff]  ;;  %v3068_v56 = vld [vmem:[%s5030_s9 + $0x68] sm:$0xff]  ;;  %v2287_v4 = vpack.c.bf16 %v2278_v1, %v2277_v58  ;;  %v3099_v58 = vld [vmem:[%s5030_s9 + $0x140] sm:$0xff] }
 0x3d8   : > { %v2304_v0 = vpack.c.bf16 %v3070_v62, %v3069_v61  ;;  %v2303_v5 = vpack.c.bf16 %v3068_v56, %v3067_v3  ;;  %v2532_v61 = vpack.c.bf16 %v3104_v60, %v3103_v59  ;;  %v3101_v62 = vld [vmem:[%s5030_s9 + $0x150] sm:$0xff]  ;;  %v3100_v1 = vld [vmem:[%s5030_s9 + $0x148] sm:$0xff] }
 0x3d9   : > { %v1928_v8 = vmax.f32 %v1924_v2, 0.0  ;;  %v2275_v2 = vld [vmem:[%s5030_s9] sm:$0xff]  ;;  %v2530_v3 = vpack.c.bf16 %v3100_v1, %v3099_v58 }
 0x3db   : > { %3036 = vmatprep.subr.msk.mxu1 %vm1530_vm7, %v1928_v8 }
 0x3dc   : > { %3037 = vmatpush1.msk.msra.mxu1 %vm1530_vm7, %v1927_v9 }
 0x3dd   : > { %1970 = vmatprep.subr.mxu1 %v1926_v11 }
 0x3de   : > { %1971 = vmatpush1.msra.mxu1 %v1925_v12 }
 0x3df   : > { %3038 = vmatmul.mubr.msk.f32.vlgmr.msra.gmra.mxu1 %vm1930_vm10, %v1929_v16  ;;  %3040 = vmatprep.subr.msk.mxu1 %vm1530_vm7, %v1928_v8  ;;  %v2286_v8 = vpack.c.bf16 %v2276_v6, %v2275_v2  ;;  %v3096_v16 = vld [vmem:[%s5030_s9 + $0x130] sm:$0xff]  ;;  %v2595_v6 = vld [vmem:[%s5032_s11 + $0x60] sm:$0xff] }
 0x3e0   : > { %3041 = vmatpush1.msk.msra.mxu1 %vm1530_vm7, %v1927_v9  ;;  %2080 = vmatprep.mubr.f32.mxu1 %v3373_v27  ;;  %v3065_v9 = vld [vmem:[%s5030_s9 + $0x50] sm:$0xff] }
 0x3e1   : > { %2046 = vmatprep.subr.mxu1 %v1926_v11  ;;  %v3066_v11 = vld [vmem:[%s5030_s9 + $0x58] sm:$0xff] }
 0x3e2   : > { %2047 = vmatpush1.msra.mxu1 %v1925_v12  ;;  %v2302_v12 = vpack.c.bf16 %v3066_v11, %v3065_v9  ;;  %v2593_v11 = vld [vmem:[%s5032_s11 + $0x50] sm:$0xff] }
 0x3e3   : > { %3042 = vmatmul.mubr.msk.f32.vlgmr.msra.gmra.mxu1 %vm1930_vm10, %v3039_v14  ;;  %2113 = vmatprep.subr.mxu1 %v3373_v27  ;;  %v3097_v14 = vld [vmem:[%s5030_s9 + $0x138] sm:$0xff] }
 0x3e4   : > { %2114 = vmatpush1.msra.mxu1 %v2104_v31 }
 0x3e5   : > { %2115 = vmatprep.subr.mxu1 %v3373_v27 }
 0x3e6   : > { %2116 = vmatpush1.msra.mxu1 %v2103_v13 }
 0x3e7   : > { %2117 = vmatprep.subr.mxu1 %v3373_v27 }
 0x3e8   : > { %2118 = vmatpush1.msra.mxu1 %v2102_v15 }
 0x3e9   : > { %2119 = vmatprep.subr.mxu1 %v3373_v27 }
 0x3ea   : > { %2120 = vmatpush1.msra.mxu1 %v2101_v18  ;;  %v3085_v18 = vld [vmem:[%s5030_s9 + $0xe0] sm:$0xff] }
 0x3eb   : > { %2121 = vmatprep.subr.mxu1 %v3373_v27 }
 0x3ec   : > { %2122 = vmatpush1.msra.mxu1 %v2100_v19  ;;  %v3086_v19 = vld [vmem:[%s5030_s9 + $0xe8] sm:$0xff] }
 0x3ed   : > { %2123 = vmatprep.subr.mxu1 %v3373_v27 }
 0x3ee   : > { %2124 = vmatpush1.msra.mxu1 %v2099_v20 }
 0x3ef   : > { %2125 = vmatprep.subr.mxu1 %v3373_v27 }
 0x3f0   : > { %2126 = vmatpush1.msra.mxu1 %v2098_v22 }
 0x3f1   : > { %2127 = vmatprep.subr.mxu1 %v3373_v27 }
 0x3f2   : > { %2128 = vmatpush1.msra.mxu1 %v2097_v23  ;;  %v2473_v23 = vpack.c.bf16 %v3097_v14, %v3096_v16  ;;  %v2591_v14 = vld [vmem:[%s5032_s11 + $0x40] sm:$0xff] }
 0x3f3   : > { %2129 = vmatprep.subr.mxu1 %v3373_v27 }
 0x3f4   : > { %2130 = vmatpush1.msra.mxu1 %v2096_v24 }
 0x3f5   : > { %2131 = vmatprep.subr.mxu1 %v3373_v27 }
 0x3f6   : > { %2132 = vmatpush1.msra.mxu1 %v2095_v25  ;;  %v3094_v25 = vld [vmem:[%s5030_s9 + $0x120] sm:$0xff] }
 0x3f7   : > { %2133 = vmatprep.subr.mxu1 %v3373_v27 }
 0x3f8   : > { %2134 = vmatpush1.msra.mxu1 %v2094_v26  ;;  %v3095_v26 = vld [vmem:[%s5030_s9 + $0x128] sm:$0xff] }
 0x3f9   : > { %2135 = vmatprep.subr.mxu1 %v3373_v27 }
 0x3fa   : > { %2136 = vmatpush1.msra.mxu1 %v2093_v10  ;;  %v2411_v10 = vpack.c.bf16 %v3086_v19, %v3085_v18  ;;  %v2590_v18 = vld [vmem:[%s5032_s11 + $0x38] sm:$0xff] }
 0x3fb   : > { %2137 = vmatprep.subr.mxu1 %v3373_v27 }
 0x3fc   : > { %2138 = vmatpush1.msra.mxu1 %v2092_v28 }
 0x3fd   : > { %2139 = vmatprep.subr.mxu1 %v3373_v27 }
 0x3fe   : > { %2140 = vmatpush1.msra.mxu1 %v2091_v29  ;;  %v3083_v29 = vld [vmem:[%s5030_s9 + $0xd0] sm:$0xff] }
 0x3ff   : > { %2141 = vmatprep.subr.mxu1 %v3373_v27 }
 0x400   : > { %2142 = vmatpush1.msra.mxu1 %v2090_v30  ;;  %v3084_v30 = vld [vmem:[%s5030_s9 + $0xd8] sm:$0xff] }
 0x401   : > { %2143 = vmatprep.subr.mxu1 %v3373_v27  ;;  %v2410_v36 = vpack.c.bf16 %v3084_v30, %v3083_v29  ;;  %v2666_v30 = vld [vmem:[%s5034_s13 + $0x50] sm:$0xf] }
 0x402   : > { %2144 = vmatpush1.msra.mxu1 %v2089_v32  ;;  %v2472_v32 = vpack.c.bf16 %v3095_v26, %v3094_v25  ;;  %v2586_v25 = vld [vmem:[%s5032_s11 + $0x18] sm:$0xff] }
 0x403   : > { %2169 = vmatprep.subr.mxu1 %v3373_v27 }
 0x404   : > { %2170 = vmatpush2.msra.mxu1 %v2108_v34  ;;  %v3093_v34 = vld [vmem:[%s5030_s9 + $0x118] sm:$0xff] }
 0x405   : > { %2171 = vmatprep.subr.mxu1 %v3373_v27 }
 0x406   : > { %2172 = vmatpush2.msra.mxu1 %v2107_v17  ;;  %v3081_v17 = vld [vmem:[%s5030_s9 + $0xc0] sm:$0xff] }
 0x407   : > { %2173 = vmatprep.subr.mxu1 %v3373_v27  ;;  %v2409_v41 = vpack.c.bf16 %v3082_v37, %v3081_v17  ;;  %v2662_v37 = vld [vmem:[%s5034_s13 + $0x30] sm:$0xff] }
 0x408   : > { %2174 = vmatpush2.msra.mxu1 %v2106_v35  ;;  %v2471_v35 = vpack.c.bf16 %v3093_v34, %v3092_v33  ;;  %v2664_v33 = vld [vmem:[%s5034_s13 + $0x40] sm:$0xff]  ;;  %v2665_v34 = vld [vmem:[%s5034_s13 + $0x48] sm:$0xff] }
 0x409   : > { %2175 = vmatprep.subr.mxu1 %v3373_v27  ;;  %v2672_v17 = vpack.c.bf16 %v2665_v34, %v2664_v33 }
 0x40a   : > { %2176 = vmatpush2.msra.mxu1 %v2105_v40  ;;  %v3091_v40 = vld [vmem:[%s5030_s9 + $0x108] sm:$0xff] }
 0x40b   : > { %3162 = vmatprep.subr.bf16.mxu1 %v3373_v27  ;;  %v2470_v42 = vpack.c.bf16 %v3091_v40, %v3090_v39  ;;  %v2660_v40 = vld [vmem:[%s5034_s13 + $0x20] sm:$0xff] }
 0x49f   : > { %v2006_v21 = vpop.f32.mrf.mxu1 }
 0x4a1   : > { %v2008_v38 = vpop.f32.mrf.mxu1 }
 0x4a3   : > { %v2082_v43 = vpop.f32.mrf.mxu1 }
 0x4a4   : > { %v2087_v52 = vmax.f32 %v2006_v21, %v2082_v43  ;;  %v3079_v21 = vld [vmem:[%s5030_s9 + $0xb0] sm:$0xff] }
 0x4a5   : > { %v2084_v47 = vpop.f32.mrf.mxu1  ;;  %v3088_v43 = vld [vmem:[%s5030_s9 + $0xf0] sm:$0xff] }
 0x4a6   : > { %v2088_v48 = vmax.f32 %v2008_v38, %v2084_v47  ;;  %v3080_v38 = vld [vmem:[%s5030_s9 + $0xb8] sm:$0xff]  ;;  %v3078_v47 = vld [vmem:[%s5030_s9 + $0xa8] sm:$0xff] }
 0x4a7   : > { %v2408_v45 = vpack.c.bf16 %v3080_v38, %v3079_v21 }
 0x4a8   : > { %3043 = vmatprep.mubr.msk.f32.mxu1 %vm2109_vm11, %v2088_v48  ;;  %3064 = vmatprep.mubr.msk.f32.mxu0 %vm2109_vm11, %v2088_v48  ;;  %v2469_v48 = vpack.c.bf16 %v3089_v44, %v3088_v43 }
 0x4a9   : > { %2178 = vmatmul.mubr.f32.vlgmr.msra.gmra.mxu1 %v2087_v52  ;;  %2269 = vmatmul.mubr.f32.vlgmr.msra.gmra.mxu0 %v2087_v52 }
 0x4aa   : > { %3177 = vmatpush3.bf16.msra.mxu0 %v2290_v49  ;;  %3163 = vmatpush3.bf16.msra.mxu1 %v2306_v50  ;;  %v2407_v49 = vpack.c.bf16 %v3078_v47, %v3077_v46  ;;  %v3107_v50 = vld [vmem:[%s5030_s9 + $0x180] sm:$0xff] }
 0x4ab   : > { %3178 = vmatprep.subr.bf16.mxu0 %v3373_v27  ;;  %3164 = vmatprep.subr.bf16.mxu1 %v3373_v27  ;;  %v2534_v53 = vpack.c.bf16 %v3108_v51, %v3107_v50 }
 0x4ac   : > { %3186 = vmatprep.mubr.msk.bf16.mxu0 %vm3374_vm12, %v3373_v27  ;;  %3172 = vmatprep.mubr.msk.bf16.mxu1 %vm3374_vm12, %v3373_v27 }
 0x4ae   : > { %3179 = vmatpush3.bf16.msra.mxu0 %v2289_v7  ;;  %3165 = vmatpush3.bf16.msra.mxu1 %v2305_v57  ;;  %v3106_v7 = vld [vmem:[%s5030_s9 + $0x178] sm:$0xff] }
 0x4af   : > { %3180 = vmatprep.subr.bf16.mxu0 %v3373_v27  ;;  %3166 = vmatprep.subr.bf16.mxu1 %v3373_v27  ;;  %v2533_v57 = vpack.c.bf16 %v3106_v7, %v3105_v55 }
 0x4b2   : > { %3181 = vmatpush3.bf16.msra.mxu0 %v2288_v63  ;;  %3167 = vmatpush3.bf16.msra.mxu1 %v2304_v0  ;;  %v3102_v63 = vld [vmem:[%s5030_s9 + $0x158] sm:$0xff] }
 0x4b3   : > { %3182 = vmatprep.subr.bf16.mxu0 %v3373_v27  ;;  %3168 = vmatprep.subr.bf16.mxu1 %v3373_v27  ;;  %v2531_v0 = vpack.c.bf16 %v3102_v63, %v3101_v62  ;;  %v2580_v62 = vld [vmem:[%s5031_s10] sm:$0x1] }
 0x4b6   : > { %3183 = vmatpush3.bf16.msra.mxu0 %v2287_v4  ;;  %3169 = vmatpush3.bf16.msra.mxu1 %v2303_v5  ;;  %v2597_v4 = vld [vmem:[%s5032_s11 + $0x70] sm:$0xff] }
 0x4b7   : > { %3184 = vmatprep.subr.bf16.mxu0 %v3373_v27  ;;  %3170 = vmatprep.subr.bf16.mxu1 %v3373_v27  ;;  %v2606_v5 = vpack.c.bf16 %v2597_v4, %v2597_v4 }
 0x4b9   : > { %v2613_v2 = vsel %vm1072_vm5, %v2606_v5, 0  ;;  %v2658_v5 = vld [vmem:[%s5034_s13 + $0x10] sm:$0xff] }
 0x4ba   : > { %3185 = vmatpush3.bf16.msra.mxu0 %v2286_v8  ;;  %3171 = vmatpush3.bf16.msra.mxu1 %v2302_v12  ;;  %v2596_v8 = vld [vmem:[%s5032_s11 + $0x68] sm:$0xff]  ;;  %v2594_v12 = vld [vmem:[%s5032_s11 + $0x58] sm:$0xff] }
 0x4bb   : > { %3204 = vmatprep.subr.bf16.mxu0 %v3373_v27  ;;  %3190 = vmatprep.subr.bf16.mxu1 %v3373_v27  ;;  %v2605_v9 = vpack.c.bf16 %v2596_v8, %v2595_v6  ;;  %v2604_v16 = vpack.c.bf16 %v2594_v12, %v2593_v11  ;;  %v2656_v8 = vld [vmem:[%s5034_s13] sm:$0xff] }
 0x4bc   : > { %v2607_v12 = vld [vmem:[%s5033_s12] sm:$0x1] }
 0x569   : > { %v2179_v31 = vpop.f32.mrf.mxu1  ;;  %v2270_v13 = vpop.f32.mrf.mxu0 }
 0x56a   : > { %v2274_v15 = vmax.f32 %v2179_v31, %v2270_v13  ;;  %v2592_v31 = vld [vmem:[%s5032_s11 + $0x48] sm:$0xff] }
 0x56b   : > { %v2181_v20 = vpop.f32.mrf.mxu1  ;;  %v2272_v22 = vpop.f32.mrf.mxu0  ;;  %v2603_v13 = vpack.c.bf16 %v2592_v31, %v2591_v14 }
 0x56c   : > { %v4759_v24 = vpack.c.bf16 %v2274_v15, %v2274_v15  ;;  %v2589_v15 = vld [vmem:[%s5032_s11 + $0x30] sm:$0xff]  ;;  %v2587_v20 = vld [vmem:[%s5032_s11 + $0x20] sm:$0xff]  ;;  %v2588_v22 = vld [vmem:[%s5032_s11 + $0x28] sm:$0xff] }
 0x56d   : > { %v2602_v19 = vpack.c.bf16 %v2590_v18, %v2589_v15 }
 0x56e   : > { %v2308_v28 = vshrl.u32 %v4759_v24, 16  ;;  %3187 = vmatmul.mubr.msk.bf16.vlgmr.msra.gmra.mxu0 %vm2310_vm13, %v4759_v24  ;;  %v2413_v54 = vrot.slane %v4759_v24, 1  ;;  %v2535_v56 = vrot.slane %v4759_v24, 2  ;;  %v2585_v24 = vld [vmem:[%s5032_s11 + $0x10] sm:$0xff] }
 0x56f   : > { %3205 = vmatpush3.bf16.msra.mxu0 %v2473_v23  ;;  %3214 = vmatprep.mubr.msk.bf16.mxu0 %vm3374_vm12, %v3373_v27  ;;  %v2601_v23 = vpack.c.bf16 %v2588_v22, %v2587_v20  ;;  %v2600_v26 = vpack.c.bf16 %v2586_v25, %v2585_v24 }
 0x570   : > { %3173 = vmatmul.mubr.msk.bf16.vlgmr.msra.gmra.mxu1 %vm2310_vm13, %v2308_v28  ;;  %3206 = vmatprep.subr.bf16.mxu0 %v3373_v27  ;;  %v2474_v52 = vrot.slane %v2308_v28, 1  ;;  %v2584_v28 = vld [vmem:[%s5032_s11 + $0x8] sm:$0xff] }
 0x571   : > { %3191 = vmatpush3.bf16.msra.mxu1 %v2411_v10  ;;  %3200 = vmatprep.mubr.msk.bf16.mxu1 %vm3374_vm12, %v3373_v27  ;;  %v2583_v10 = vld [vmem:[%s5032_s11] sm:$0xff] }
 0x572   : > { %3192 = vmatprep.subr.bf16.mxu1 %v3373_v27  ;;  %v2599_v29 = vpack.c.bf16 %v2584_v28, %v2583_v10 }
 0x573   : > { %3207 = vmatpush3.bf16.msra.mxu0 %v2472_v32  ;;  %v2673_v32 = vpack.c.bf16 %v2666_v30, %v2666_v30 }
 0x574   : > { %3208 = vmatprep.subr.bf16.mxu0 %v3373_v27 }
 0x575   : > { %3193 = vmatpush3.bf16.msra.mxu1 %v2410_v36  ;;  %v2679_v36 = vsel %vm1530_vm7, %v2673_v32, 0 }
 0x576   : > { %3194 = vmatprep.subr.bf16.mxu1 %v3373_v27 }
 0x577   : > { %3209 = vmatpush3.bf16.msra.mxu0 %v2471_v35  ;;  %v2663_v35 = vld [vmem:[%s5034_s13 + $0x38] sm:$0xff] }
 0x578   : > { %3210 = vmatprep.subr.bf16.mxu0 %v3373_v27  ;;  %v2671_v39 = vpack.c.bf16 %v2663_v35, %v2662_v37 }
 0x579   : > { %3195 = vmatpush3.bf16.msra.mxu1 %v2409_v41  ;;  %v2661_v41 = vld [vmem:[%s5034_s13 + $0x28] sm:$0xff] }
 0x57a   : > { %3196 = vmatprep.subr.bf16.mxu1 %v3373_v27  ;;  %v2670_v21 = vpack.c.bf16 %v2661_v41, %v2660_v40 }
 0x57b   : > { %3211 = vmatpush3.bf16.msra.mxu0 %v2470_v42 }
 0x57c   : > { %3212 = vmatprep.subr.bf16.mxu0 %v3373_v27 }
 0x57d   : > { %3197 = vmatpush3.bf16.msra.mxu1 %v2408_v45 }
 0x57e   : > { %3198 = vmatprep.subr.bf16.mxu1 %v3373_v27 }
 0x57f   : > { %3213 = vmatpush3.bf16.msra.mxu0 %v2469_v48 }
 0x580   : > { %3232 = vmatprep.subr.bf16.mxu0 %v3373_v27 }
 0x581   : > { %3199 = vmatpush3.bf16.msra.mxu1 %v2407_v49 }
 0x582   : > { %3215 = vmatmul.mubr.msk.bf16.vlgmr.msra.gmra.mxu0 %vm2310_vm13, %v2474_v52  ;;  %3218 = vmatprep.subr.bf16.mxu1 %v3373_v27 }
 0x583   : > { %3248 = vmatprep.mubr.msk.bf16.mxu0 %vm3374_vm12, %v3373_v27  ;;  %3233 = vmatpush3.bf16.msra.mxu0 %v2613_v2  ;;  %v2659_v2 = vld [vmem:[%s5034_s13 + $0x18] sm:$0xff] }
 0x584   : > { %3201 = vmatmul.mubr.msk.bf16.vlgmr.msra.gmra.mxu1 %vm2310_vm13, %v2413_v54  ;;  %3234 = vmatprep.subr.bf16.mxu0 %v3373_v27  ;;  %v2669_v6 = vpack.c.bf16 %v2659_v2, %v2658_v5 }
 0x585   : > { %3219 = vmatpush3.bf16.msra.mxu1 %v2534_v53  ;;  %3228 = vmatprep.mubr.msk.bf16.mxu1 %vm3374_vm12, %v3373_v27 }
 0x586   : > { %3220 = vmatprep.subr.bf16.mxu1 %v3373_v27 }
 0x587   : > { %3235 = vmatpush3.bf16.msra.mxu0 %v2605_v9  ;;  %v2657_v9 = vld [vmem:[%s5034_s13 + $0x8] sm:$0xff] }
 0x588   : > { %3236 = vmatprep.subr.bf16.mxu0 %v3373_v27  ;;  %v2668_v11 = vpack.c.bf16 %v2657_v9, %v2656_v8 }
 0x589   : > { %3221 = vmatpush3.bf16.msra.mxu1 %v2533_v57 }
 0x58a   : > { %3222 = vmatprep.subr.bf16.mxu1 %v3373_v27 }
 0x58b   : > { %3237 = vmatpush3.bf16.msra.mxu0 %v2604_v16 }
 0x58c   : > { %3238 = vmatprep.subr.bf16.mxu0 %v3373_v27 }
 0x58d   : > { %3223 = vmatpush3.bf16.msra.mxu1 %v2532_v61 }
 0x58e   : > { %3224 = vmatprep.subr.bf16.mxu1 %v3373_v27 }
 0x58f   : > { %3239 = vmatpush3.bf16.msra.mxu0 %v2603_v13 }
 0x590   : > { %3240 = vmatprep.subr.bf16.mxu0 %v3373_v27 }
 0x591   : > { %3225 = vmatpush3.bf16.msra.mxu1 %v2531_v0 }
 0x592   : > { %3226 = vmatprep.subr.bf16.mxu1 %v3373_v27 }
 0x593   : > { %3241 = vmatpush3.bf16.msra.mxu0 %v2602_v19  ;;  %v2674_v19 = vld [vmem:[%s5035_s14] sm:$0x1] }
 0x594   : > { %3242 = vmatprep.subr.bf16.mxu0 %v3373_v27 }
 0x595   : > { %3227 = vmatpush3.bf16.msra.mxu1 %v2530_v3 }
 0x596   : > { %3252 = vmatprep.subr.bf16.mxu1 %v3373_v27 }
 0x597   : > { %3243 = vmatpush3.bf16.msra.mxu0 %v2601_v23 }
 0x598   : > { %3229 = vmatmul.mubr.msk.bf16.vlgmr.msra.gmra.mxu1 %vm2310_vm13, %v2535_v56  ;;  %3244 = vmatprep.subr.bf16.mxu0 %v3373_v27 }
 0x599   : > { %3264 = vmatprep.mubr.msk.bf16.mxu1 %vm3374_vm12, %v3373_v27  ;;  %3253 = vmatpush3.bf16.msra.mxu1 %v2679_v36 }
 0x59a   : > { %3254 = vmatprep.subr.bf16.mxu1 %v3373_v27 }
 0x59b   : > { %3245 = vmatpush3.bf16.msra.mxu0 %v2600_v26 }
 0x59c   : > { %3246 = vmatprep.subr.bf16.mxu0 %v3373_v27 }
 0x59d   : > { %3255 = vmatpush3.bf16.msra.mxu1 %v2672_v17 }
 0x59e   : > { %3256 = vmatprep.subr.bf16.mxu1 %v3373_v27 }
 0x59f   : > { %3247 = vmatpush3.bf16.msra.mxu0 %v2599_v29 }
 0x5a1   : > { %3257 = vmatpush3.bf16.msra.mxu1 %v2671_v39 }
 0x5a2   : > { %3258 = vmatprep.subr.bf16.mxu1 %v3373_v27 }
 0x5a5   : > { %3259 = vmatpush3.bf16.msra.mxu1 %v2670_v21 }
 0x5a6   : > { %3260 = vmatprep.subr.bf16.mxu1 %v3373_v27 }
 0x5a9   : > { %3261 = vmatpush3.bf16.msra.mxu1 %v2669_v6 }
 0x5aa   : > { %3262 = vmatprep.subr.bf16.mxu1 %v3373_v27 }
 0x5ad   : > { %3263 = vmatpush3.bf16.msra.mxu1 %v2668_v11 }
 0x62e   : > { %v2390_v38 = vpop.f32.mrf.mxu0 }
 0x630   : > { %v2348_v42 = vpop.f32.mrf.mxu1  ;;  %v3188_v43 = vpop.f32.mrf.mxu0 }
 0x631   : > { %v2391_v57 = vadd.f32 %v2390_v38, %v2348_v42 }
 0x632   : > { %v3174_v44 = vpop.f32.mrf.mxu1  ;;  %v2393_v45 = vpop.f32.mrf.mxu0 }
 0x634   : > { %v2351_v46 = vpop.f32.mrf.mxu1  ;;  %v3189_v47 = vpop.f32.mrf.mxu0 }
 0x636   : > { %v3175_v48 = vpop.f32.mrf.mxu1 }
 0x642   : > { %v2512_v49 = vpop.f32.mrf.mxu0 }
 0x644   : > { %v2451_v50 = vpop.f32.mrf.mxu1  ;;  %v3216_v51 = vpop.f32.mrf.mxu0 }
 0x645   : > { %v2457_v59 = vadd.f32 %v2451_v50, %v2391_v57 }
 0x646   : > { %v3202_v52 = vpop.f32.mrf.mxu1  ;;  %v2515_v53 = vpop.f32.mrf.mxu0 }
 0x647   : > { %v2518_v60 = vadd.f32 %v2512_v49, %v2457_v59 }
 0x648   : > { %v2454_v54 = vpop.f32.mrf.mxu1  ;;  %v3217_v55 = vpop.f32.mrf.mxu0 }
 0x64a   : > { %v3203_v7 = vpop.f32.mrf.mxu1 }
 0x658   : > { %v2573_v61 = vpop.f32.mrf.mxu1 }
 0x659   : > { %v2579_v63 = vadd.f32 %v2573_v61, %v2518_v60 }
 0x65a   : > { %v3230_v0 = vpop.f32.mrf.mxu1 }
 0x65b   : > { %v2581_v58 = vadd.f32 %v2580_v62, %v2579_v63 }
 0x65c   : > { %v2576_v1 = vpop.f32.mrf.mxu1 }
 0x65d   : > { %v2582_v3 = vmax.f32 %v2581_v58, 0.0 }
 0x65e   : > { %v3231_v56 = vpop.f32.mrf.mxu1 }
 0x65f   : > { %v2598_v4 = vpack.c.bf16 %v2582_v3, %v2582_v3 }
 0x661   : > { %3249 = vmatmul.mubr.msk.bf16.vlgmr.msra.gmra.mxu0 %vm2608_vm14, %v2598_v4 }
 0x721   : > { %v2649_v16 = vpop.f32.mrf.mxu0 }
 0x722   : > { %v2650_v14 = vadd.f32 %v2649_v16, %v2607_v12 }
 0x723   : > { %v3250_v31 = vpop.f32.mrf.mxu0 }
 0x724   : > { %v2655_v13 = vmax.f32 %v2650_v14, 0.0 }
 0x725   : > { %v2652_v27 = vpop.f32.mrf.mxu0 }
 0x726   : > { %v2667_v15 = vpack.c.bf16 %v2655_v13, %v2655_v13 }
 0x727   : > { %v3251_v18 = vpop.f32.mrf.mxu0 }
 0x728   : > { %3265 = vmatmul.mubr.msk.bf16.vlgmr.msra.gmra.mxu1 %vm1526_vm9, %v2667_v15 }
 0x7e8   : > { %v2715_v20 = vpop.f32.mrf.mxu1 }
 0x7e9   : > { %v2716_v22 = vadd.f32 %v2715_v20, %v2674_v19 }
 0x7ea   : > { %v3266_v23 = vpop.f32.mrf.mxu1 }
 0x7eb   : > { %2722 = vst.msk [vmem:[%s486_s18] sm:$0x1] %vm2721_vm15, %v2716_v22 }
 0x7ec   : > { %v2718_v24 = vpop.f32.mrf.mxu1 }
 0x7ed   : > { %3323 = shalt.err (!%p3320_p3)
}
 0x7ee   : > { %s3324_s23 = scalar_lea.hbm %s4980_s25, 16  ;;  %s3328_s18 = scalar_lea.hbm %s5053_s27, 32 }
 0x7ef   : > { %p3325_p4 = scmp.ne.s32.totalorder %s4980_s25, %s3324_s23  ;;  %p3329_p9 = scmp.lt.s32.totalorder %s4980_s25, %s5053_s27 }
 0x7f0   : > { %p3330_p10 = scmp.lt.s32.totalorder %s3328_s18, %s3324_s23 }
 0x7f1   : > { %p3326_p7 = pnand %p3325_p4, %p3494_p5 }
 0x7f2   : > { %p3331_p11 = por %p3330_p10, %p3329_p9 }
 0x7f3   : > { %p3327_p8 = pneg %p3326_p7 }
 0x7f5   : > { %p3332_p12 = pnand %p3331_p11, %p3327_p8 }
 0x7f7   : > { %3335 = shalt.err (!%p3332_p12)
}
 0x7f8   : > { %3268 = dma.vmem_to_hbm [thread:$0]  (%p3494_p5), %s4982_s24, 16, %s4980_s25, %s2724_s26   ;;  %v3267_v25 = vpop.f32.mrf.mxu1 }
 0x7f9 PF: > { %s5054_s22 = sld [smem:[#allocation7_spill]] }
 0x7fa   : > { %s5055_s30 = sld [smem:[#allocation5_spill]] }
 0x7ff   : > { %p3274_p13 = scmp.ge.s32.totalorder %s5054_s22, 2 }
 0x800   : > { %s2748_s21 = sand.u32 1, %s5055_s30  }
 0x801   : > { %p3271_p0 = pnand %p3274_p13, %p3498_p6  ;;  %s2749_s17 = scalar_lea.sflag [#allocation3], %s2748_s21 }
 0x803   : > { %p3272_p1 = pneg %p3271_p0 }
 0x805   : > { %3353 = dma.done.wait (%p3272_p1), %s2749_s17, 16  }
 0x806   : > { %3355 = vsyncadd (%p3272_p1), %s2749_s17, 4294967280  ;;  %s5057_s21 = sld [smem:[#allocation8_spill]]  ;;  %s5060_s18 = smov %s3362_s19 }
 0x807   : > { %s5058_s23 = sld [smem:[#allocation6_spill]] }
 0x808   : > { %s5059_s20 = sld [smem:[#allocation9_spill]] }
 0x80c   : > { %p25_p2 = scmp.ge.s32.totalorder %s5057_s21, 4  }
 0x80d   : > { %s5061_s19 = smov %s5058_s23 }
 0x80e   :  { %27 = sbr.rel (!%p25_p2) target bundleno = 5 (0x5), region = 131 }
 0x813   :  { %2753 = vsyncpa [#allocation3], 1 }
 0x814   :  { %2755 = vsyncpa [#allocation3 + $0x1], 1 }

</bundles_post_ra>
